<compile_context>
chip_gen: v7x
topology: tpu7x:2x2x1
jax: 0.10.0
libtpu: 0.0.40
codegen_flags: <defaults>
</compile_context>

<pallas_src>
import math

import jax
import jax.numpy as jnp
from jax.experimental import pallas as pl
from jax.experimental.pallas import tpu as pltpu
from jax.scipy.linalg import block_diag as _jsp_block_diag


def dnn2_kernel(x_ref, w1_ref, w2_ref, o_ref):
    # x_ref:  (tm/pack, pack*F)      lane-dense packed activations (streams)
    # w1_ref: (pack*F, pack*32)      block-diagonal W1 (resident)
    # w2_ref: (pack*32, pack*H)      block-diagonal W2 (resident)
    # o_ref:  (tm/pack, pack*H)      lane-dense packed output (streams)
    h = jnp.dot(x_ref[...], w1_ref[...], preferred_element_type=jnp.float32)
    h = jnp.maximum(h, 0.0)  # ReLU on the f32 accumulator
    y = jnp.dot(h.astype(w2_ref.dtype), w2_ref[...],
                preferred_element_type=jnp.float32)
    # Already lane-dense packed layout: a plain full-lane store, no relayout.
    o_ref[...] = y.astype(o_ref.dtype)


def _dnn2_reference(x, w1, w2):
    # Plain XLA fusion; also the fallback path for tiny / ragged batches.
    return jnp.dot(jnp.maximum(jnp.dot(x, w1), 0.0), w2)


def _block_diag(w, copies):
    # blockdiag(copies x w): out[c*f:(c+1)*f, c*k:(c+1)*k] = w
    return _jsp_block_diag(*([w] * copies))


def _choose_tm(n, pack):
    """Largest batch tile (in logical rows) that divides N, is compatible with the
    row-packing factor, and keeps the packed sublane dim a multiple of 16 (safe for
    both f32 and bf16 tiling).  Prefers an even grid with >= 4 steps so both v7x
    TensorCores get >= 2 tiles each (keeps DMA/compute overlapped on both cores)."""
    candidates = (32768, 16384, 8192, 4096, 2048, 1024, 512, 256)

    def ok(tm):
        return n % tm == 0 and tm % pack == 0 and (tm // pack) % 16 == 0

    for tm in candidates:                       # best: even grid, >= 4 steps
        if ok(tm) and n // tm >= 4 and (n // tm) % 2 == 0:
            return tm
    for tm in candidates:                       # next: at least 2 steps
        if ok(tm) and n // tm >= 2:
            return tm
    for tm in candidates:                       # last resort: single step
        if ok(tm):
            return tm
    return None


def dnn2_forward(x, w1, w2, *, tm=None, use_bf16=True, out_bf16=False,
                 min_pallas_batch=4096):
    n, f = x.shape
    f1, k = w1.shape
    k2, h = w2.shape
    assert f == f1 and k == k2

    out_dtype = jnp.bfloat16 if out_bf16 else x.dtype

    # Row-packing factor: fold `pack` consecutive rows of x into one lane-dense
    # (pack*f)-wide row, with pack*f a multiple of 128 (full-width contiguous DMA).
    pack = 128 // math.gcd(f, 128)

    usable = (n % pack == 0)
    if usable:
        if tm is None:
            tm = _choose_tm(n, pack)
        elif n % tm != 0 or tm % pack != 0 or (tm // pack) % 16 != 0:
            tm = None
        usable = tm is not None

    # Tiny or ragged batches: launch + DMA setup would dominate; let XLA fuse it.
    if not usable or n < min_pallas_batch:
        return _dnn2_reference(x, w1, w2).astype(out_dtype)

    # Memory-bound kernel: stream data as bf16 by default; MXU still accumulates
    # in f32 and ReLU runs on the f32 accumulator.  use_bf16=False keeps f32
    # streaming for reference-exact numerics.
    compute_dtype = jnp.bfloat16 if use_bf16 else x.dtype

    # Lane-dense packed input: [n, f] -> [n/pack, pack*f]  (free row-major reshape).
    x_packed = x.astype(compute_dtype).reshape(n // pack, pack * f)
    # Block-diagonal weights, built once in the wrapper; resident across the grid.
    w1_bd = _block_diag(w1.astype(compute_dtype), pack)   # [pack*f, pack*k]
    w2_bd = _block_diag(w2.astype(compute_dtype), pack)   # [pack*k, pack*h]

    out_packed = pl.pallas_call(
        dnn2_kernel,
        out_shape=jax.ShapeDtypeStruct((n // pack, pack * h), out_dtype),
        grid_spec=pltpu.PrefetchScalarGridSpec(
            num_scalar_prefetch=0,
            grid=(n // tm,),
            in_specs=[
                pl.BlockSpec((tm // pack, pack * f), lambda i: (i, 0)),  # x: streams
                pl.BlockSpec((pack * f, pack * k), lambda i: (0, 0)),    # W1 bd: resident
                pl.BlockSpec((pack * k, pack * h), lambda i: (0, 0)),    # W2 bd: resident
            ],
            out_specs=pl.BlockSpec((tm // pack, pack * h), lambda i: (i, 0)),
        ),
        compiler_params=pltpu.CompilerParams(
            dimension_semantics=("parallel",),
            # Worst case (tm=32768, f32 streaming): ~2 MiB x + ~8 MiB out (double
            # buffered) + ~2.5 MiB weights  -> well under 32 MiB, which is safe on
            # v5e/v6e (128 MiB physical) and v7x (64 MiB physical).
            vmem_limit_bytes=32 * 1024 * 1024,
        ),
    )(x_packed, w1_bd, w2_bd)

    # Free row-major reshape back to the logical [N, H] layout.
    return out_packed.reshape(n, h)


def xavier_normal(key, shape, gain):
    fan_in, fan_out = shape
    std = gain * math.sqrt(2.0 / (fan_in + fan_out))
    return std * jax.random.normal(key, shape, dtype=jnp.float32)


if __name__ == "__main__":
    num_features, hidden_size = 8, 32

    key = jax.random.PRNGKey(0)
    kx, kw1, kw2, kbig = jax.random.split(key, 4)

    # DNNLayer params, xavier_normal_(gain=1.414), deterministic in-script init.
    w1 = xavier_normal(kw1, (num_features, 32), gain=1.414)
    w2 = xavier_normal(kw2, (32, hidden_size), gain=1.414)

    # 1) Small batch consistent with the module: guarded path -> plain XLA fusion.
    x_small = jax.random.normal(kx, (16, num_features), dtype=jnp.float32)
    out_small = jax.block_until_ready(dnn2_forward(x_small, w1, w2))
    ref_small = _dnn2_reference(x_small, w1, w2)
    assert out_small.shape == (16, hidden_size)
    assert jnp.allclose(out_small, ref_small, atol=1e-5, rtol=1e-5)

    # 2) Production-like batch: exercises the Pallas kernel (grid of 4 even steps).
    x_big = jax.random.normal(kbig, (16384, num_features), dtype=jnp.float32)
    ref_big = _dnn2_reference(x_big, w1, w2)

    # f32-streamed Pallas path (reference-exact up to MXU f32 rounding).
    out_f32 = jax.block_until_ready(dnn2_forward(x_big, w1, w2, use_bf16=False))
    assert out_f32.shape == (16384, hidden_size)
    assert jnp.allclose(out_f32, ref_big, atol=5e-3, rtol=5e-3)

    # Default bf16-streamed Pallas path (looser tolerance for bf16 rounding).
    out_bf16_stream = jax.block_until_ready(dnn2_forward(x_big, w1, w2))
    assert out_bf16_stream.shape == (16384, hidden_size)
    assert jnp.allclose(out_bf16_stream, ref_big, atol=5e-2, rtol=5e-2)

    # Optional bf16-output path (halves the dominant output HBM stream).
    out_all_bf16 = jax.block_until_ready(dnn2_forward(x_big, w1, w2, out_bf16=True))
    assert out_all_bf16.shape == (16384, hidden_size)
    assert out_all_bf16.dtype == jnp.bfloat16
    assert jnp.allclose(out_all_bf16.astype(jnp.float32), ref_big, atol=5e-2, rtol=5e-2)

    print("KERNEL_OK")
</pallas_src>

<mosaic_0001>
module attributes {stable_mosaic.version = 11 : i64} {
  func.func @dnn2_kernel(%arg0: i32, %arg1: memref<256x128xf32, #tpu.memory_space<vmem>>, %arg2: memref<128x512xf32, #tpu.memory_space<vmem>>, %arg3: memref<512x512xf32, #tpu.memory_space<vmem>>, %arg4: memref<256x512xf32, #tpu.memory_space<vmem>>) attributes {dimension_semantics = [#tpu.dimension_semantics<parallel>], iteration_bounds = array<i64: 4>, scalar_prefetch = 0 : i64, scratch_operands = 0 : i64, tpu.core_type = #tpu.core_type<tc>, window_params = [{transform_indices = @transform_0, window_bounds = array<i64: 256, 128>}, {pipeline_mode = #tpu.pipeline_mode<synchronous>, transform_indices = @transform_1, window_bounds = array<i64: 128, 512>}, {pipeline_mode = #tpu.pipeline_mode<synchronous>, transform_indices = @transform_2, window_bounds = array<i64: 512, 512>}, {transform_indices = @transform_3, window_bounds = array<i64: 256, 512>}]} {
    %c0 = arith.constant 0 : index
    %c0_0 = arith.constant 0 : index
    %0 = vector.load %arg1[%c0, %c0_0] : memref<256x128xf32, #tpu.memory_space<vmem>>, vector<256x128xf32>
    %c0_1 = arith.constant 0 : index
    %c0_2 = arith.constant 0 : index
    %1 = vector.load %arg2[%c0_1, %c0_2] : memref<128x512xf32, #tpu.memory_space<vmem>>, vector<128x512xf32>
    %cst = arith.constant dense<0.000000e+00> : vector<256x512xf32>
    %2 = tpu.matmul %0, %1, %cst {dimension_numbers = #tpu.dot_dimension_numbers<[1], [0], [0], [1], [0, 0, 1, 1], [], []>} : vector<256x128xf32>, vector<128x512xf32>, vector<256x512xf32> -> vector<256x512xf32>
    %cst_3 = arith.constant 0.000000e+00 : f32
    %3 = vector.broadcast %cst_3 : f32 to vector<256x512xf32>
    %4 = arith.maximumf %2, %3 : vector<256x512xf32>
    %c0_4 = arith.constant 0 : index
    %c0_5 = arith.constant 0 : index
    %5 = vector.load %arg3[%c0_4, %c0_5] : memref<512x512xf32, #tpu.memory_space<vmem>>, vector<512x512xf32>
    %cst_6 = arith.constant dense<0.000000e+00> : vector<256x512xf32>
    %6 = tpu.matmul %4, %5, %cst_6 {dimension_numbers = #tpu.dot_dimension_numbers<[1], [0], [0], [1], [0, 0, 1, 1], [], []>} : vector<256x512xf32>, vector<512x512xf32>, vector<256x512xf32> -> vector<256x512xf32>
    %c0_7 = arith.constant 0 : index
    %c0_8 = arith.constant 0 : index
    %7 = vector.load %arg4[%c0_7, %c0_8] : memref<256x512xf32, #tpu.memory_space<vmem>>, vector<256x512xf32>
    tpu.vector_store %arg4[%c0_7, %c0_8], %6 {strides = array<i32>} : memref<256x512xf32, #tpu.memory_space<vmem>>, vector<256x512xf32>,
    return
  }
  func.func @transform_0(%arg0: i32) -> (i32, i32) {
    %c0_i32 = arith.constant 0 : i32
    %c0_i32_0 = arith.constant 0 : i32
    return %arg0, %c0_i32 : i32, i32
  }
  func.func @transform_1(%arg0: i32) -> (i32, i32) {
    %c0_i32 = arith.constant 0 : i32
    %c0_i32_0 = arith.constant 0 : i32
    %c0_i32_1 = arith.constant 0 : i32
    return %c0_i32, %c0_i32_0 : i32, i32
  }
  func.func @transform_2(%arg0: i32) -> (i32, i32) {
    %c0_i32 = arith.constant 0 : i32
    %c0_i32_0 = arith.constant 0 : i32
    %c0_i32_1 = arith.constant 0 : i32
    return %c0_i32, %c0_i32_0 : i32, i32
  }
  func.func @transform_3(%arg0: i32) -> (i32, i32) {
    %c0_i32 = arith.constant 0 : i32
    %c0_i32_0 = arith.constant 0 : i32
    return %arg0, %c0_i32 : i32, i32
  }
}

</mosaic_0001>

<bundles_post_ra>
// kernel: tpu_custom_call.1
= control target key start
LH: loop header
LB: loop body
LE: loop exit
PB: predicated region body
PF: predicated region fallthrough
CT: control target
= control target key end

     0   :  { %8 = vsyncpa [#allocation3], 0  ;;  %s3917_s0 = inlined_call_operand.hbm [shape: f32[1024,128], index: 0, kind: input, shape index: {}]   ;;  %s3918_s1 = inlined_call_operand.hbm [shape: f32[128,512], index: 1, kind: input, shape index: {}]   ;;  %s3919_s2 = inlined_call_operand.hbm [shape: f32[512,512], index: 2, kind: input, shape index: {}]   ;;  %s3920_s3 = inlined_call_operand.hbm [shape: f32[1024,512], index: 3, kind: output, shape index: {}]  }
   0x1   :  { %10 = vsyncpa [#allocation3 + $0x1], 0 }
   0x2   :  { %11 = vsyncpa [#allocation6], 0 }
   0x3   :  { %12 = vsyncpa [#allocation4], 0 }
   0x4   :  { %14 = vsyncpa [#allocation4 + $0x1], 0  ;;  %s3210_s12 = smov 0   ;;  %s3212_s13 = smov 0  }
   0x5   :  { %s3214_s14 = smov 0   ;;  %s3216_s15 = smov 0  }
   0x6 LB: > { %s3231_s16 = sadd.s32 4294967295, %s3177_s15   ;;  %s2477_s17 = sadd.s32 4294967294, %s3177_s15   ;;  %s3177_s15 = sphi %s3216_s15, %s3945_s15   ;;  %s3173_s14 = sphi %s3214_s14, %s3944_s14   ;;  %s3169_s13 = sphi %s3212_s13, %s3943_s13   ;;  %s3165_s12 = sphi %s3210_s12, %s3942_s12  }
   0x7   : > { %p40_p0 = scmp.ne.s32.totalorder %s3169_s13, %s3165_s12  ;;  %p3921_p1 = scmp.eq.s32.totalorder %s3231_s16, 0 }
   0x8   : > { %p112_p3 = scmp.eq.s32.totalorder %s2477_s17, 3  ;;  %p2478_p5 = scmp.ge.s32.totalorder %s3177_s15, 1 }
   0x9   : > { %p3240_p4 = por %p3921_p1, %p40_p0  ;;  %p119_p7 = scmp.lt.s32.totalorder %s3177_s15, 5 }
   0xa   : > { %p3245_p6 = por %p112_p3, %p40_p0  ;;  %s3179_s21 = smov [#allocation5]  }
   0xb   : > { %s3924_s18 = scalar_select %p3240_p4, 1, 0 }
   0xc   : > { %s3925_s19 = scalar_select %p3245_p6, 1, 0 }
   0xd   : > { %p3250_p8 = pnand %p2478_p5, %p119_p7  ;;  %s131_s22 = sshll.u32 %s3179_s21, 4  ;;  %s132_s22 = int_to_ptr.vmem [resolvable:$true] %s131_s22 }
   0xe   : > { %s3180_s24 = smov [#allocation7]   ;;  %s3021_s28 = scalar_lea.hbm %s3918_s1, 8192 }
   0xf   : > { %s3926_s20 = scalar_select %p3250_p8, 1, 0 }
  0x10   : > { %p2959_p9 = pneg %p3250_p8  ;;  %s144_s25 = sshll.u32 %s3180_s24, 4  ;;  %s3262_s25 = int_to_ptr.vmem [resolvable:$true] %s144_s25 }
  0x11   : > { %p3022_p11 = scmp.ne.s32.totalorder %s3918_s1, %s3021_s28  ;;  %p3028_p3 = scmp.lt.u32.totalorder %s3021_s28, %s3918_s1 }
  0x12   : > { %p3258_p10 = pnand %p2959_p9, %p3921_p1 }
  0x14   : > { %p3023_p12 = pneg %p3258_p10 }
  0x16   : > { %p3024_p13 = pnand %p3023_p12, %p3022_p11 }
  0x18   : > { %p3025_p0 = pneg %p3024_p13 }
  0x1a   : > { %p3030_p5 = pnand %p3028_p3, %p3025_p0 }
  0x1c   : > { %3033 = shalt.err (!%p3030_p5)
}
  0x1d   : > { %s3034_s6 = scalar_lea.vmem %s132_s22, 8192  ;;  %p3042_p2 = scmp.lt.s32.totalorder %s132_s22, %s132_s22 }
  0x1e   : > { %p3035_p7 = scmp.ne.s32.totalorder %s132_s22, %s3034_s6  ;;  %p3043_p6 = scmp.lt.s32.totalorder %s3034_s6, %s3034_s6 }
  0x20   : > { %p3037_p9 = pnand %p3035_p7, %p3023_p12  ;;  %p3044_p4 = por %p3043_p6, %p3042_p2 }
  0x22   : > { %p3038_p1 = pneg %p3037_p9 }
  0x24   : > { %p3045_p8 = pnand %p3044_p4, %p3038_p1 }
  0x26   : > { %3048 = shalt.err (!%p3045_p8)
}
  0x27   : > { %s3181_s7 = smov 512   ;;  %s3182_s8 = smov 32  }
  0x28   : > { %2962 = dma.hbm_to_vmem [thread:$0]  (!%p3258_p10), %s3918_s1, 8192, %s132_s22, [#allocation6], %s3181_s7, %s3181_s7, %s3182_s8  }
  0x29   : > { %s3049_s21 = scalar_lea.hbm %s3919_s2, 32768 }
  0x2a   : > { %p3050_p11 = scmp.ne.s32.totalorder %s3919_s2, %s3049_s21  ;;  %p3056_p4 = scmp.lt.u32.totalorder %s3049_s21, %s3919_s2 }
  0x2c   : > { %p3052_p1 = pnand %p3050_p11, %p3023_p12 }
  0x2e   : > { %p3053_p2 = pneg %p3052_p1 }
  0x30   : > { %p3058_p6 = pnand %p3056_p4, %p3053_p2 }
  0x32   : > { %3061 = shalt.err (!%p3058_p6)
}
  0x33   : > { %s3062_s22 = scalar_lea.vmem %s3262_s25, 32768  ;;  %p3070_p3 = scmp.lt.s32.totalorder %s3262_s25, %s3262_s25 }
  0x34   : > { %p3063_p8 = scmp.ne.s32.totalorder %s3262_s25, %s3062_s22  ;;  %p3071_p5 = scmp.lt.s32.totalorder %s3062_s22, %s3062_s22 }
  0x36   : > { %p3065_p13 = pnand %p3063_p8, %p3023_p12  ;;  %p3072_p7 = por %p3071_p5, %p3070_p3 }
  0x38   : > { %p3066_p0 = pneg %p3065_p13 }
  0x3a   : > { %p3073_p9 = pnand %p3072_p7, %p3066_p0 }
  0x3c   : > { %3076 = shalt.err (!%p3073_p9)
}
  0x3d   : > { %2965 = dma.hbm_to_vmem [thread:$0]  (!%p3258_p10), %s3919_s2, 32768, %s3262_s25, [#allocation6], %s3181_s7, %s3181_s7, %s3182_s8  }
  0x3e   : > { %s3312_s4 = sadd.s32 1, %s3177_s15   ;;  %s27_s23 = sadd.s32 1, %s3173_s14 }
  0x3f   : > { %s24_s5 = ssub.s32 %s3177_s15, %s3312_s4  ;;  %p34_p12 = scmp.ne.s32.totalorder %s3173_s14, %s3169_s13 }
  0x40   : > { %p25_p11 = scmp.eq.s32.totalorder %s24_s5, 0  ;;  %p35_p1 = scmp.eq.s32.totalorder %s3177_s15, 0 }
  0x41   : > { %p3928_p2 = scmp.eq.s32.totalorder %s3231_s16, 3  ;;  %p2976_p6 = scmp.lt.s32.totalorder %s3177_s15, 4 }
  0x42   : > { %s3328_s9 = scalar_select %p25_p11, %s3173_s14, %s27_s23  }
  0x43   : > { %p3322_p4 = por %p3928_p2, %p34_p12  ;;  %p36_p8 = por %p35_p1, %p34_p12 }
  0x44   : > { %s158_s10 = sand.u32 1, %s3173_s14   ;;  %s2496_s25 = sshll.u32 %s3177_s15, 12 }
  0x45   : > { %s2482_s11 = sshll.u32 %s158_s10, 8  ;;  %s3335_s17 = scalar_lea.hbm %s3917_s0, %s2496_s25 }
  0x46   : > { %s162_s21 = scalar_lea.vmem [#allocation2], %s2482_s11  ;;  %p3339_p10 = pnand %p2976_p6, %p36_p8 }
  0x47   : > { %s169_s24 = sshll.u32 %s162_s21, 4  ;;  %s3343_s27 = scalar_lea.sflag [#allocation3], %s158_s10  ;;  %s3337_s24 = int_to_ptr.vmem [resolvable:$true] %s169_s24 }
  0x48   : > { %s3077_s28 = scalar_lea.hbm %s3335_s17, 4096  ;;  %p3079_p0 = pneg %p3339_p10 }
  0x49   : > { %p3078_p13 = scmp.ne.s32.totalorder %s3335_s17, %s3077_s28  ;;  %s3082_s30 = scalar_lea.hbm %s3917_s0, 16384 }
  0x4a   : > { %p3083_p7 = scmp.lt.u32.totalorder %s3335_s17, %s3917_s0  ;;  %p3084_p9 = scmp.lt.u32.totalorder %s3082_s30, %s3077_s28 }
  0x4b   : > { %p3080_p3 = pnand %p3079_p0, %p3078_p13  ;;  %p3086_p11 = scmp.lt.u32.totalorder %s3077_s28, %s3335_s17 }
  0x4c   : > { %p3085_p12 = por %p3084_p9, %p3083_p7 }
  0x4d   : > { %p3081_p5 = pneg %p3080_p3 }
  0x4e   : > { %p3087_p1 = por %p3086_p11, %p3085_p12 }
  0x50   : > { %p3088_p2 = pnand %p3087_p1, %p3081_p5 }
  0x52   : > { %3091 = shalt.err (!%p3088_p2)
}
  0x53   : > { %s3092_s10 = scalar_lea.vmem %s3337_s24, 4096  ;;  %s3183_s11 = smov [#allocation2]  }
  0x54   : > { %p3093_p6 = scmp.ne.s32.totalorder %s3337_s24, %s3092_s10  ;;  %s3097_s25 = sshll.u32 %s3183_s11, 4  ;;  %s3098_s25 = int_to_ptr.vmem [resolvable:$false] %s3097_s25 }
  0x55   : > { %s3099_s7 = scalar_lea.vmem %s3098_s25, 8192  ;;  %p3100_p3 = scmp.lt.s32.totalorder %s3337_s24, %s3098_s25 }
  0x56   : > { %p3095_p8 = pnand %p3093_p6, %p3079_p0  ;;  %p3101_p7 = scmp.lt.s32.totalorder %s3099_s7, %s3092_s10 }
  0x58   : > { %p3096_p13 = pneg %p3095_p8  ;;  %p3102_p9 = por %p3101_p7, %p3100_p3 }
  0x5a   : > { %p3103_p12 = pnand %p3102_p9, %p3096_p13 }
  0x5c   : > { %3106 = shalt.err (!%p3103_p12)
}
  0x5d   : > { %s3184_s8 = smov 128   ;;  %s3185_s21 = smov 8  }
  0x5e   : > { %2969 = dma.hbm_to_vmem [thread:$0]  (!%p3339_p10), %s3335_s17, 4096, %s3337_s24, %s3343_s27, %s3184_s8, %s3184_s8, %s3185_s21  }
  0x5f   : > { %p3931_p0 = scmp.ne.s32.totalorder %s3926_s20, 0 }
  0x61   : > { %181 = sbr.rel (%p3931_p0) target bundleno = 843 (0x34b), region = 32 }
  0x68   : > { %s3374_s28 = sand.u32 1, %s3169_s13   ;;  %p3932_p5 = scmp.ne.s32.totalorder %s3924_s18, 0 }
  0x69   : > { %s2486_s22 = sshll.u32 %s3374_s28, 8  ;;  %s184_s29 = scalar_lea.sflag [#allocation3], %s3374_s28 }
  0x6a   : > { %s3378_s30 = scalar_lea.vmem [#allocation2], %s2486_s22 }
  0x6b   : > { %3152 = dma.done.wait (%p3932_p5), %s184_s29, 4096  }
  0x6c   : > { %3154 = vsyncadd (%p3932_p5), %s184_s29, 4294963200  ;;  %p3933_p10 = scmp.eq.s32.totalorder %s3231_s16, 0 }
  0x6e   : > { %3156 = dma.done.wait (%p3933_p10), [#allocation6], 40960   ;;  %p3934_p11 = pmov %p3933_p10 }
  0x6f   : > { %v3186_v0 = vmov 0.0   ;;  %v253_v1 = vld [vmem:[#allocation5 + $0x8] sm:$0xff]  ;;  %v252_v3 = vld [vmem:[#allocation5] sm:$0xff]  ;;  %v255_v34 = vld [vmem:[#allocation5 + $0x18] sm:$0xff]  ;;  %s2489_s18 = sshll.u32 %s3374_s28, 10  ;;  %s2498_s17 = sshll.u32 %s3231_s16, 14 }
  0x70   : > { %3158 = vsyncadd (%p3934_p11), [#allocation6], 4294926336  ;;  %380 = vmatprep.mubr.f32.mxu0 %v3186_v0  ;;  %637 = vmatprep.mubr.f32.mxu1 %v3186_v0  ;;  %v257_v2 = vld [vmem:[#allocation5 + $0x28] sm:$0xff]  ;;  %v256_v5 = vld [vmem:[#allocation5 + $0x20] sm:$0xff]  ;;  %s3737_s20 = scalar_lea.vmem [#allocation8], %s2489_s18  ;;  %s3868_s23 = scalar_lea.hbm %s3920_s3, %s2498_s17 }
  0x71   : > { %v2499_v4 = vpack.c.bf16 %v257_v2, %v253_v1  ;;  %v261_v6 = vld [vmem:[#allocation5 + $0x48] sm:$0xff]  ;;  %v2501_v8 = vpack.c.bf16 %v256_v5, %v252_v3  ;;  %v260_v10 = vld [vmem:[#allocation5 + $0x40] sm:$0xff]  ;;  %v259_v35 = vld [vmem:[#allocation5 + $0x38] sm:$0xff]  ;;  %s2385_s24 = sshll.u32 %s3737_s20, 4  ;;  %s2371_s16 = scalar_lea.sflag [#allocation4], %s3374_s28  ;;  %s3870_s24 = int_to_ptr.vmem [resolvable:$true] %s2385_s24 }
  0x72   : > { %v265_v7 = vld [vmem:[#allocation5 + $0x68] sm:$0xff]  ;;  %v264_v11 = vld [vmem:[#allocation5 + $0x60] sm:$0xff]  ;;  %v2531_v38 = vpack.c.bf16 %v259_v35, %v255_v34  ;;  %v254_v39 = vld [vmem:[#allocation5 + $0x10] sm:$0xff]  ;;  %s3107_s5 = scalar_lea.vmem %s3870_s24, 16384  ;;  %s3187_s10 = smov [#allocation8]  }
  0x73   : > { %v2503_v9 = vpack.c.bf16 %v265_v7, %v261_v6  ;;  %v269_v12 = vld [vmem:[#allocation5 + $0x88] sm:$0xff]  ;;  %2500 = vmatprep.subr.bf16.mxu0 %v2499_v4  ;;  %v2505_v14 = vpack.c.bf16 %v264_v11, %v260_v10  ;;  %v268_v16 = vld [vmem:[#allocation5 + $0x80] sm:$0xff]  ;;  %v258_v40 = vld [vmem:[#allocation5 + $0x30] sm:$0xff]  ;;  %p3108_p1 = scmp.ne.s32.totalorder %s3870_s24, %s3107_s5  ;;  %s3111_s11 = sshll.u32 %s3187_s10, 4  ;;  %s3112_s11 = int_to_ptr.vmem [resolvable:$false] %s3111_s11 }
  0x74   : > { %v273_v13 = vld [vmem:[#allocation5 + $0xa8] sm:$0xff]  ;;  %2502 = vmatpush1.bf16.msra.mxu0 %v2501_v8  ;;  %v272_v17 = vld [vmem:[#allocation5 + $0xa0] sm:$0xff]  ;;  %v2533_v43 = vpack.c.bf16 %v258_v40, %v254_v39  ;;  %v263_v44 = vld [vmem:[#allocation5 + $0x58] sm:$0xff]  ;;  %2532 = vmatprep.subr.bf16.mxu1 %v2531_v38  ;;  %s3113_s25 = scalar_lea.vmem %s3112_s11, 32768  ;;  %p3114_p8 = scmp.lt.s32.totalorder %s3870_s24, %s3112_s11 }
  0x75   : > { %2504 = vmatprep.subr.bf16.mxu0 %v2503_v9  ;;  %v2507_v15 = vpack.c.bf16 %v273_v13, %v269_v12  ;;  %v277_v18 = vld [vmem:[#allocation5 + $0xc8] sm:$0xff]  ;;  %v2509_v20 = vpack.c.bf16 %v272_v17, %v268_v16  ;;  %v276_v22 = vld [vmem:[#allocation5 + $0xc0] sm:$0xff]  ;;  %v267_v45 = vld [vmem:[#allocation5 + $0x78] sm:$0xff]  ;;  %p3109_p2 = pnand %p3108_p1, %p3322_p4  ;;  %p3115_p13 = scmp.lt.s32.totalorder %s3113_s25, %s3107_s5 }
  0x76   : > { %v281_v19 = vld [vmem:[#allocation5 + $0xe8] sm:$0xff]  ;;  %v280_v23 = vld [vmem:[#allocation5 + $0xe0] sm:$0xff]  ;;  %v2535_v46 = vpack.c.bf16 %v267_v45, %v263_v44  ;;  %v262_v47 = vld [vmem:[#allocation5 + $0x50] sm:$0xff]  ;;  %2534 = vmatpush1.bf16.msra.mxu1 %v2533_v43 }
  0x77   : > { %v2511_v21 = vpack.c.bf16 %v281_v19, %v277_v18  ;;  %v285_v24 = vld [vmem:[#allocation5 + $0x108] sm:$0xff]  ;;  %v2513_v26 = vpack.c.bf16 %v280_v23, %v276_v22  ;;  %v284_v28 = vld [vmem:[#allocation5 + $0x100] sm:$0xff]  ;;  %v266_v48 = vld [vmem:[#allocation5 + $0x70] sm:$0xff]  ;;  %p3110_p6 = pneg %p3109_p2  ;;  %p3116_p3 = por %p3115_p13, %p3114_p8 }
  0x78   : > { %2506 = vmatpush1.bf16.msra.mxu0 %v2505_v14  ;;  %v289_v25 = vld [vmem:[#allocation5 + $0x128] sm:$0xff]  ;;  %v288_v29 = vld [vmem:[#allocation5 + $0x120] sm:$0xff]  ;;  %v271_v49 = vld [vmem:[#allocation5 + $0x98] sm:$0xff]  ;;  %v2537_v50 = vpack.c.bf16 %v266_v48, %v262_v47  ;;  %2536 = vmatprep.subr.bf16.mxu1 %v2535_v46 }
  0x79   : > { %2508 = vmatprep.subr.bf16.mxu0 %v2507_v15  ;;  %v2515_v27 = vpack.c.bf16 %v289_v25, %v285_v24  ;;  %v293_v30 = vld [vmem:[#allocation5 + $0x148] sm:$0xff]  ;;  %v292_v32 = vld [vmem:[#allocation5 + $0x140] sm:$0xff]  ;;  %v2517_v36 = vpack.c.bf16 %v288_v29, %v284_v28  ;;  %v275_v51 = vld [vmem:[#allocation5 + $0xb8] sm:$0xff]  ;;  %p3117_p7 = pnand %p3116_p3, %p3110_p6 }
  0x7a   : > { %v297_v31 = vld [vmem:[#allocation5 + $0x168] sm:$0xff]  ;;  %v296_v33 = vld [vmem:[#allocation5 + $0x160] sm:$0xff]  ;;  %v2539_v54 = vpack.c.bf16 %v275_v51, %v271_v49  ;;  %v270_v55 = vld [vmem:[#allocation5 + $0x90] sm:$0xff]  ;;  %2538 = vmatpush1.bf16.msra.mxu1 %v2537_v50 }
  0x7b   : > { %v301_v37 = vld [vmem:[#allocation5 + $0x188] sm:$0xff]  ;;  %v2519_v41 = vpack.c.bf16 %v297_v31, %v293_v30  ;;  %v2521_v52 = vpack.c.bf16 %v296_v33, %v292_v32  ;;  %v300_v53 = vld [vmem:[#allocation5 + $0x180] sm:$0xff]  ;;  %v274_v56 = vld [vmem:[#allocation5 + $0xb0] sm:$0xff] }
  0x7c   : > { %2510 = vmatpush1.bf16.msra.mxu0 %v2509_v20  ;;  %v305_v42 = vld [vmem:[#allocation5 + $0x1a8] sm:$0xff]  ;;  %v304_v58 = vld [vmem:[#allocation5 + $0x1a0] sm:$0xff]  ;;  %v279_v59 = vld [vmem:[#allocation5 + $0xd8] sm:$0xff]  ;;  %v2541_v63 = vpack.c.bf16 %v274_v56, %v270_v55  ;;  %2540 = vmatprep.subr.bf16.mxu1 %v2539_v54 }
  0x7d   : > { %2512 = vmatprep.subr.bf16.mxu0 %v2511_v21  ;;  %v2523_v57 = vpack.c.bf16 %v305_v42, %v301_v37  ;;  %v283_v60 = vld [vmem:[#allocation5 + $0xf8] sm:$0xff]  ;;  %v309_v61 = vld [vmem:[#allocation5 + $0x1c8] sm:$0xff]  ;;  %v2525_v1 = vpack.c.bf16 %v304_v58, %v300_v53  ;;  %v308_v2 = vld [vmem:[#allocation5 + $0x1c0] sm:$0xff] }
  0x7e   : > { %v313_v62 = vld [vmem:[#allocation5 + $0x1e8] sm:$0xff]  ;;  %v2543_v3 = vpack.c.bf16 %v283_v60, %v279_v59  ;;  %v278_v4 = vld [vmem:[#allocation5 + $0xd0] sm:$0xff]  ;;  %v312_v7 = vld [vmem:[#allocation5 + $0x1e0] sm:$0xff]  ;;  %2542 = vmatpush1.bf16.msra.mxu1 %v2541_v63 }
  0x7f   : > { %v282_v5 = vld [vmem:[#allocation5 + $0xf0] sm:$0xff]  ;;  %v2527_v6 = vpack.c.bf16 %v313_v62, %v309_v61  ;;  %v287_v8 = vld [vmem:[#allocation5 + $0x118] sm:$0xff]  ;;  %v2529_v11 = vpack.c.bf16 %v312_v7, %v308_v2  ;;  %v959_v15 = vld [vmem:[#allocation7 + $0x8] sm:$0xff] }
  0x80   : > { %2514 = vmatpush1.bf16.msra.mxu0 %v2513_v26  ;;  %v291_v9 = vld [vmem:[#allocation5 + $0x138] sm:$0xff]  ;;  %v2545_v10 = vpack.c.bf16 %v282_v5, %v278_v4  ;;  %2544 = vmatprep.subr.bf16.mxu1 %v2543_v3  ;;  %v286_v13 = vld [vmem:[#allocation5 + $0x110] sm:$0xff]  ;;  %v963_v18 = vld [vmem:[#allocation7 + $0x28] sm:$0xff] }
  0x81   : > { %2516 = vmatprep.subr.bf16.mxu0 %v2515_v27  ;;  %v2547_v12 = vpack.c.bf16 %v291_v9, %v287_v8  ;;  %v290_v14 = vld [vmem:[#allocation5 + $0x130] sm:$0xff]  ;;  %v295_v16 = vld [vmem:[#allocation5 + $0x158] sm:$0xff]  ;;  %v2563_v19 = vpack.c.bf16 %v963_v18, %v959_v15  ;;  %v958_v20 = vld [vmem:[#allocation7] sm:$0xff] }
  0x82   : > { %v299_v17 = vld [vmem:[#allocation5 + $0x178] sm:$0xff]  ;;  %v962_v21 = vld [vmem:[#allocation7 + $0x20] sm:$0xff]  ;;  %2546 = vmatpush1.bf16.msra.mxu1 %v2545_v10  ;;  %v2549_v23 = vpack.c.bf16 %v290_v14, %v286_v13  ;;  %v294_v24 = vld [vmem:[#allocation5 + $0x150] sm:$0xff] }
  0x83   : > { %v3391_v22 = vld [vmem:[%s3378_s30] sm:$0xff]  ;;  %2548 = vmatprep.subr.bf16.mxu1 %v2547_v12  ;;  %v2551_v25 = vpack.c.bf16 %v299_v17, %v295_v16  ;;  %v298_v26 = vld [vmem:[#allocation5 + $0x170] sm:$0xff]  ;;  %v967_v27 = vld [vmem:[#allocation7 + $0x48] sm:$0xff]  ;;  %v2565_v31 = vpack.c.bf16 %v962_v21, %v958_v20 }
  0x84   : > { %2518 = vmatpush1.bf16.msra.mxu0 %v2517_v36  ;;  %v971_v28 = vld [vmem:[#allocation7 + $0x68] sm:$0xff]  ;;  %v303_v29 = vld [vmem:[#allocation5 + $0x198] sm:$0xff]  ;;  %v966_v33 = vld [vmem:[#allocation7 + $0x40] sm:$0xff]  ;;  %v2553_v35 = vpack.c.bf16 %v298_v26, %v294_v24 }
  0x85   : > { %2520 = vmatprep.subr.bf16.mxu0 %v2519_v41  ;;  %v307_v30 = vld [vmem:[#allocation5 + $0x1b8] sm:$0xff]  ;;  %v2567_v32 = vpack.c.bf16 %v971_v28, %v967_v27  ;;  %v970_v34 = vld [vmem:[#allocation7 + $0x60] sm:$0xff]  ;;  %v975_v36 = vld [vmem:[#allocation7 + $0x88] sm:$0xff] }
  0x86   : > { %2550 = vmatpush1.bf16.msra.mxu1 %v2549_v23  ;;  %v979_v37 = vld [vmem:[#allocation7 + $0xa8] sm:$0xff]  ;;  %v2555_v39 = vpack.c.bf16 %v307_v30, %v303_v29  ;;  %v302_v40 = vld [vmem:[#allocation5 + $0x190] sm:$0xff]  ;;  %v311_v42 = vld [vmem:[#allocation5 + $0x1d8] sm:$0xff]  ;;  %v2569_v44 = vpack.c.bf16 %v970_v34, %v966_v33 }
  0x87   : > { %v3396_v38 = vld [vmem:[%s3378_s30 + $0x8] sm:$0xff]  ;;  %2552 = vmatprep.subr.bf16.mxu1 %v2551_v25  ;;  %v306_v41 = vld [vmem:[#allocation5 + $0x1b0] sm:$0xff]  ;;  %v315_v43 = vld [vmem:[#allocation5 + $0x1f8] sm:$0xff]  ;;  %v2571_v45 = vpack.c.bf16 %v979_v37, %v975_v36 }
  0x88   : > { %2522 = vmatpush1.bf16.msra.mxu0 %v2521_v52  ;;  %v974_v46 = vld [vmem:[#allocation7 + $0x80] sm:$0xff]  ;;  %v2557_v48 = vpack.c.bf16 %v306_v41, %v302_v40  ;;  %v983_v49 = vld [vmem:[#allocation7 + $0xc8] sm:$0xff]  ;;  %v3401_v51 = vld [vmem:[%s3378_s30 + $0x10] sm:$0xff]  ;;  %v2559_v52 = vpack.c.bf16 %v315_v43, %v311_v42 }
  0x89   : > { %2524 = vmatprep.subr.bf16.mxu0 %v2523_v57  ;;  %v978_v47 = vld [vmem:[#allocation7 + $0xa0] sm:$0xff]  ;;  %v987_v50 = vld [vmem:[#allocation7 + $0xe8] sm:$0xff]  ;;  %v310_v53 = vld [vmem:[#allocation5 + $0x1d0] sm:$0xff] }
  0x8a   : > { %2554 = vmatpush1.bf16.msra.mxu1 %v2553_v35  ;;  %v314_v54 = vld [vmem:[#allocation5 + $0x1f0] sm:$0xff]  ;;  %v961_v55 = vld [vmem:[#allocation7 + $0x18] sm:$0xff]  ;;  %v2573_v57 = vpack.c.bf16 %v978_v47, %v974_v46  ;;  %v2575_v58 = vpack.c.bf16 %v987_v50, %v983_v49  ;;  %v982_v59 = vld [vmem:[#allocation7 + $0xc0] sm:$0xff] }
  0x8b   : > { %2556 = vmatprep.subr.bf16.mxu1 %v2555_v39  ;;  %v965_v56 = vld [vmem:[#allocation7 + $0x38] sm:$0xff]  ;;  %v986_v60 = vld [vmem:[#allocation7 + $0xe0] sm:$0xff]  ;;  %v2561_v61 = vpack.c.bf16 %v314_v54, %v310_v53  ;;  %v991_v62 = vld [vmem:[#allocation7 + $0x108] sm:$0xff] }
  0x8c   : > { %2526 = vmatpush1.bf16.msra.mxu0 %v2525_v1  ;;  %v995_v63 = vld [vmem:[#allocation7 + $0x128] sm:$0xff]  ;;  %v3406_v1 = vld [vmem:[%s3378_s30 + $0x18] sm:$0xff]  ;;  %v2691_v2 = vpack.c.bf16 %v965_v56, %v961_v55  ;;  %v960_v3 = vld [vmem:[#allocation7 + $0x10] sm:$0xff] }
  0x8d   : > { %2528 = vmatprep.subr.bf16.mxu0 %v2527_v6  ;;  %v964_v4 = vld [vmem:[#allocation7 + $0x30] sm:$0xff]  ;;  %v969_v5 = vld [vmem:[#allocation7 + $0x58] sm:$0xff]  ;;  %v2577_v6 = vpack.c.bf16 %v986_v60, %v982_v59  ;;  %v2579_v8 = vpack.c.bf16 %v995_v63, %v991_v62  ;;  %v990_v9 = vld [vmem:[#allocation7 + $0x100] sm:$0xff] }
  0x8e   : > { %2558 = vmatpush1.bf16.msra.mxu1 %v2557_v48  ;;  %v973_v7 = vld [vmem:[#allocation7 + $0x78] sm:$0xff]  ;;  %v994_v10 = vld [vmem:[#allocation7 + $0x120] sm:$0xff]  ;;  %v999_v12 = vld [vmem:[#allocation7 + $0x148] sm:$0xff] }
  0x8f   : > { %2560 = vmatprep.subr.bf16.mxu1 %v2559_v52  ;;  %v1003_v13 = vld [vmem:[#allocation7 + $0x168] sm:$0xff]  ;;  %v3411_v14 = vld [vmem:[%s3378_s30 + $0x20] sm:$0xff]  ;;  %v2695_v15 = vpack.c.bf16 %v973_v7, %v969_v5  ;;  %v968_v16 = vld [vmem:[#allocation7 + $0x50] sm:$0xff] }
  0x90   : > { %2530 = vmatpush1.bf16.msra.mxu0 %v2529_v11  ;;  %v2693_v11 = vpack.c.bf16 %v964_v4, %v960_v3  ;;  %v972_v17 = vld [vmem:[#allocation7 + $0x70] sm:$0xff]  ;;  %v977_v18 = vld [vmem:[#allocation7 + $0x98] sm:$0xff]  ;;  %v2583_v21 = vpack.c.bf16 %v1003_v13, %v999_v12  ;;  %v998_v23 = vld [vmem:[#allocation7 + $0x140] sm:$0xff] }
  0x91   : > { %2564 = vmatprep.subr.bf16.mxu0 %v2563_v19  ;;  %v2581_v19 = vpack.c.bf16 %v994_v10, %v990_v9  ;;  %v981_v20 = vld [vmem:[#allocation7 + $0xb8] sm:$0xff]  ;;  %v1002_v24 = vld [vmem:[#allocation7 + $0x160] sm:$0xff]  ;;  %v1007_v25 = vld [vmem:[#allocation7 + $0x188] sm:$0xff]  ;;  %v2697_v28 = vpack.c.bf16 %v972_v17, %v968_v16 }
  0x92   : > { %2562 = vmatpush1.bf16.msra.mxu1 %v2561_v61  ;;  %v1011_v26 = vld [vmem:[#allocation7 + $0x1a8] sm:$0xff]  ;;  %v2699_v29 = vpack.c.bf16 %v981_v20, %v977_v18  ;;  %v980_v30 = vld [vmem:[#allocation7 + $0xb0] sm:$0xff]  ;;  %v989_v33 = vld [vmem:[#allocation7 + $0xf8] sm:$0xff] }
  0x93   : > { %381 = vmatmul.mubr.f32.vlgmr.msra.gmra.mrb[0].mxu0 %v3391_v22  ;;  %2692 = vmatprep.subr.bf16.mxu1 %v2691_v2  ;;  %v3417_v27 = vld [vmem:[%s3378_s30 + $0x28] sm:$0xff]  ;;  %v2587_v34 = vpack.c.bf16 %v1011_v26, %v1007_v25  ;;  %v1006_v35 = vld [vmem:[#allocation7 + $0x180] sm:$0xff]  ;;  %v3425_v40 = vld [vmem:[%s3378_s30 + $0x30] sm:$0xff] }
  0x94   : > { %386 = vmatprep.mubr.f32.mxu0 %v3186_v0  ;;  %2566 = vmatpush1.bf16.msra.mxu0 %v2565_v31  ;;  %v985_v31 = vld [vmem:[#allocation7 + $0xd8] sm:$0xff]  ;;  %v1010_v36 = vld [vmem:[#allocation7 + $0x1a0] sm:$0xff]  ;;  %v1015_v37 = vld [vmem:[#allocation7 + $0x1c8] sm:$0xff] }
  0x95   : > { %2568 = vmatprep.subr.bf16.mxu0 %v2567_v32  ;;  %638 = vmatmul.mubr.f32.vlgmr.msra.gmra.mrb[0].mxu1 %v3391_v22  ;;  %v976_v22 = vld [vmem:[#allocation7 + $0x90] sm:$0xff]  ;;  %v2585_v32 = vpack.c.bf16 %v1002_v24, %v998_v23  ;;  %v1019_v39 = vld [vmem:[#allocation7 + $0x1e8] sm:$0xff]  ;;  %v2703_v42 = vpack.c.bf16 %v989_v33, %v985_v31  ;;  %v997_v46 = vld [vmem:[#allocation7 + $0x138] sm:$0xff] }
  0x96   : > { %2694 = vmatpush1.bf16.msra.mxu1 %v2693_v11  ;;  %643 = vmatprep.mubr.f32.mxu1 %v3186_v0  ;;  %v2701_v41 = vpack.c.bf16 %v980_v30, %v976_v22  ;;  %v988_v43 = vld [vmem:[#allocation7 + $0xf0] sm:$0xff]  ;;  %v2591_v47 = vpack.c.bf16 %v1019_v39, %v1015_v37  ;;  %v1014_v48 = vld [vmem:[#allocation7 + $0x1c0] sm:$0xff]  ;;  %v1023_v50 = vld [vmem:[#allocation7 + $0x208] sm:$0xff] }
  0x97   : > { %387 = vmatmul.mubr.f32.gmra.mrb[2].mxu0 %v3396_v38  ;;  %2696 = vmatprep.subr.bf16.mxu1 %v2695_v15  ;;  %v1018_v49 = vld [vmem:[#allocation7 + $0x1e0] sm:$0xff]  ;;  %v1027_v52 = vld [vmem:[#allocation7 + $0x228] sm:$0xff]  ;;  %v3432_v53 = vld [vmem:[%s3378_s30 + $0x38] sm:$0xff] }
  0x98   : > { %392 = vmatprep.mubr.f32.mxu0 %v3186_v0  ;;  %2570 = vmatpush1.bf16.msra.mxu0 %v2569_v44  ;;  %v993_v44 = vld [vmem:[#allocation7 + $0x118] sm:$0xff]  ;;  %v996_v56 = vld [vmem:[#allocation7 + $0x130] sm:$0xff]  ;;  %v2595_v60 = vpack.c.bf16 %v1027_v52, %v1023_v50  ;;  %v1022_v61 = vld [vmem:[#allocation7 + $0x200] sm:$0xff] }
  0x99   : > { %2572 = vmatprep.subr.bf16.mxu0 %v2571_v45  ;;  %644 = vmatmul.mubr.f32.gmra.mrb[2].mxu1 %v3396_v38  ;;  %v984_v38 = vld [vmem:[#allocation7 + $0xd0] sm:$0xff]  ;;  %v2589_v45 = vpack.c.bf16 %v1010_v36, %v1006_v35  ;;  %v2707_v55 = vpack.c.bf16 %v997_v46, %v993_v44  ;;  %v1005_v59 = vld [vmem:[#allocation7 + $0x178] sm:$0xff]  ;;  %v1026_v62 = vld [vmem:[#allocation7 + $0x220] sm:$0xff] }
  0x9a   : > { %649 = vmatprep.mubr.f32.mxu1 %v3186_v0  ;;  %2698 = vmatpush1.bf16.msra.mxu1 %v2697_v28  ;;  %v2705_v54 = vpack.c.bf16 %v988_v43, %v984_v38  ;;  %v1031_v63 = vld [vmem:[#allocation7 + $0x248] sm:$0xff]  ;;  %v3439_v3 = vld [vmem:[%s3378_s30 + $0x40] sm:$0xff]  ;;  %v1009_v7 = vld [vmem:[#allocation7 + $0x198] sm:$0xff] }
  0x9b   : > { %393 = vmatmul.mubr.f32.gmra.mrb[4].mxu0 %v3401_v51  ;;  %2700 = vmatprep.subr.bf16.mxu1 %v2699_v29  ;;  %v1035_v2 = vld [vmem:[#allocation7 + $0x268] sm:$0xff]  ;;  %v1013_v9 = vld [vmem:[#allocation7 + $0x1b8] sm:$0xff]  ;;  %v1030_v11 = vld [vmem:[#allocation7 + $0x240] sm:$0xff] }
  0x9c   : > { %398 = vmatprep.mubr.f32.mxu0 %v3186_v0  ;;  %2574 = vmatpush1.bf16.msra.mxu0 %v2573_v57  ;;  %v1001_v57 = vld [vmem:[#allocation7 + $0x158] sm:$0xff]  ;;  %v2599_v10 = vpack.c.bf16 %v1035_v2, %v1031_v63  ;;  %v1034_v12 = vld [vmem:[#allocation7 + $0x260] sm:$0xff]  ;;  %v1039_v13 = vld [vmem:[#allocation7 + $0x288] sm:$0xff]  ;;  %v2715_v18 = vpack.c.bf16 %v1013_v9, %v1009_v7 }
  0x9d   : > { %2576 = vmatprep.subr.bf16.mxu0 %v2575_v58  ;;  %650 = vmatmul.mubr.f32.gmra.mrb[4].mxu1 %v3401_v51  ;;  %v992_v51 = vld [vmem:[#allocation7 + $0x110] sm:$0xff]  ;;  %v2593_v58 = vpack.c.bf16 %v1018_v49, %v1014_v48  ;;  %v2711_v5 = vpack.c.bf16 %v1005_v59, %v1001_v57  ;;  %v1043_v15 = vld [vmem:[#allocation7 + $0x2a8] sm:$0xff]  ;;  %v1017_v20 = vld [vmem:[#allocation7 + $0x1d8] sm:$0xff] }
  0x9e   : > { %655 = vmatprep.mubr.f32.mxu1 %v3186_v0  ;;  %2702 = vmatpush1.bf16.msra.mxu1 %v2701_v41  ;;  %v2709_v4 = vpack.c.bf16 %v996_v56, %v992_v51  ;;  %v3446_v16 = vld [vmem:[%s3378_s30 + $0x48] sm:$0xff]  ;;  %v1021_v23 = vld [vmem:[#allocation7 + $0x1f8] sm:$0xff]  ;;  %v2603_v24 = vpack.c.bf16 %v1043_v15, %v1039_v13  ;;  %v1038_v25 = vld [vmem:[#allocation7 + $0x280] sm:$0xff] }
  0x9f   : > { %399 = vmatmul.mubr.f32.gmra.mrb[6].mxu0 %v3406_v1  ;;  %2704 = vmatprep.subr.bf16.mxu1 %v2703_v42  ;;  %v1042_v26 = vld [vmem:[#allocation7 + $0x2a0] sm:$0xff]  ;;  %v1047_v28 = vld [vmem:[#allocation7 + $0x2c8] sm:$0xff]  ;;  %v3453_v22 = vld [vmem:[%s3378_s30 + $0x50] sm:$0xff]  ;;  %v2719_v31 = vpack.c.bf16 %v1021_v23, %v1017_v20 }
  0xa0   : > { %404 = vmatprep.mubr.f32.mxu0 %v3186_v0  ;;  %2578 = vmatpush1.bf16.msra.mxu0 %v2577_v6  ;;  %v1004_v6 = vld [vmem:[#allocation7 + $0x170] sm:$0xff]  ;;  %v1051_v29 = vld [vmem:[#allocation7 + $0x2e8] sm:$0xff]  ;;  %v1025_v33 = vld [vmem:[#allocation7 + $0x218] sm:$0xff] }
  0xa1   : > { %2580 = vmatprep.subr.bf16.mxu0 %v2579_v8  ;;  %656 = vmatmul.mubr.f32.gmra.mrb[6].mxu1 %v3406_v1  ;;  %v1000_v1 = vld [vmem:[#allocation7 + $0x150] sm:$0xff]  ;;  %v2597_v8 = vpack.c.bf16 %v1026_v62, %v1022_v61  ;;  %v1029_v35 = vld [vmem:[#allocation7 + $0x238] sm:$0xff]  ;;  %v2607_v36 = vpack.c.bf16 %v1051_v29, %v1047_v28  ;;  %v1046_v37 = vld [vmem:[#allocation7 + $0x2c0] sm:$0xff] }
  0xa2   : > { %661 = vmatprep.mubr.f32.mxu1 %v3186_v0  ;;  %2706 = vmatpush1.bf16.msra.mxu1 %v2705_v54  ;;  %v2713_v17 = vpack.c.bf16 %v1004_v6, %v1000_v1  ;;  %v1050_v39 = vld [vmem:[#allocation7 + $0x2e0] sm:$0xff]  ;;  %v1055_v41 = vld [vmem:[#allocation7 + $0x308] sm:$0xff]  ;;  %v3460_v38 = vld [vmem:[%s3378_s30 + $0x58] sm:$0xff]  ;;  %v2723_v44 = vpack.c.bf16 %v1029_v35, %v1025_v33 }
  0xa3   : > { %405 = vmatmul.mubr.f32.gmra.mrb[8].mxu0 %v3411_v14  ;;  %2708 = vmatprep.subr.bf16.mxu1 %v2707_v55  ;;  %v1059_v42 = vld [vmem:[#allocation7 + $0x328] sm:$0xff]  ;;  %v1033_v46 = vld [vmem:[#allocation7 + $0x258] sm:$0xff]  ;;  %v1054_v50 = vld [vmem:[#allocation7 + $0x300] sm:$0xff] }
  0xa4   : > { %410 = vmatprep.mubr.f32.mxu0 %v3186_v0  ;;  %2582 = vmatpush1.bf16.msra.mxu0 %v2581_v19  ;;  %v1012_v19 = vld [vmem:[#allocation7 + $0x1b0] sm:$0xff]  ;;  %v1037_v48 = vld [vmem:[#allocation7 + $0x278] sm:$0xff]  ;;  %v2611_v49 = vpack.c.bf16 %v1059_v42, %v1055_v41  ;;  %v1058_v52 = vld [vmem:[#allocation7 + $0x320] sm:$0xff] }
  0xa5   : > { %2584 = vmatprep.subr.bf16.mxu0 %v2583_v21  ;;  %662 = vmatmul.mubr.f32.gmra.mrb[8].mxu1 %v3411_v14  ;;  %v1008_v14 = vld [vmem:[#allocation7 + $0x190] sm:$0xff]  ;;  %v2601_v21 = vpack.c.bf16 %v1034_v12, %v1030_v11  ;;  %v1063_v54 = vld [vmem:[#allocation7 + $0x348] sm:$0xff]  ;;  %v3467_v51 = vld [vmem:[%s3378_s30 + $0x60] sm:$0xff]  ;;  %v2727_v57 = vpack.c.bf16 %v1037_v48, %v1033_v46 }
  0xa6   : > { %667 = vmatprep.mubr.f32.mxu1 %v3186_v0  ;;  %2710 = vmatpush1.bf16.msra.mxu1 %v2709_v4  ;;  %v2717_v30 = vpack.c.bf16 %v1012_v19, %v1008_v14  ;;  %v1067_v55 = vld [vmem:[#allocation7 + $0x368] sm:$0xff]  ;;  %v1041_v59 = vld [vmem:[#allocation7 + $0x298] sm:$0xff]  ;;  %v1062_v63 = vld [vmem:[#allocation7 + $0x340] sm:$0xff] }
  0xa7   : > { %411 = vmatmul.mubr.f32.gmra.mrb[10].mxu0 %v3417_v27  ;;  %2712 = vmatprep.subr.bf16.mxu1 %v2711_v5  ;;  %v1045_v61 = vld [vmem:[#allocation7 + $0x2b8] sm:$0xff]  ;;  %v2615_v62 = vpack.c.bf16 %v1067_v55, %v1063_v54  ;;  %v1066_v2 = vld [vmem:[#allocation7 + $0x360] sm:$0xff]  ;;  %v1071_v4 = vld [vmem:[#allocation7 + $0x388] sm:$0xff] }
  0xa8   : > { %416 = vmatprep.mubr.f32.mxu0 %v3186_v0  ;;  %2586 = vmatpush1.bf16.msra.mxu0 %v2585_v32  ;;  %v1020_v32 = vld [vmem:[#allocation7 + $0x1f0] sm:$0xff]  ;;  %v1075_v5 = vld [vmem:[#allocation7 + $0x3a8] sm:$0xff]  ;;  %v2731_v7 = vpack.c.bf16 %v1045_v61, %v1041_v59  ;;  %v1049_v9 = vld [vmem:[#allocation7 + $0x2d8] sm:$0xff] }
  0xa9   : > { %2588 = vmatprep.subr.bf16.mxu0 %v2587_v34  ;;  %668 = vmatmul.mubr.f32.gmra.mrb[10].mxu1 %v3417_v27  ;;  %v1016_v27 = vld [vmem:[#allocation7 + $0x1d0] sm:$0xff]  ;;  %v2605_v34 = vpack.c.bf16 %v1042_v26, %v1038_v25  ;;  %v3474_v1 = vld [vmem:[%s3378_s30 + $0x68] sm:$0xff]  ;;  %v1053_v11 = vld [vmem:[#allocation7 + $0x2f8] sm:$0xff]  ;;  %v2619_v12 = vpack.c.bf16 %v1075_v5, %v1071_v4 }
  0xaa   : > { %673 = vmatprep.mubr.f32.mxu1 %v3186_v0  ;;  %2714 = vmatpush1.bf16.msra.mxu1 %v2713_v17  ;;  %v2721_v43 = vpack.c.bf16 %v1020_v32, %v1016_v27  ;;  %v1070_v13 = vld [vmem:[#allocation7 + $0x380] sm:$0xff]  ;;  %v1079_v17 = vld [vmem:[#allocation7 + $0x3c8] sm:$0xff]  ;;  %v3481_v14 = vld [vmem:[%s3378_s30 + $0x70] sm:$0xff] }
  0xab   : > { %417 = vmatmul.mubr.f32.gmra.mrb[12].mxu0 %v3425_v40  ;;  %2716 = vmatprep.subr.bf16.mxu1 %v2715_v18  ;;  %v1074_v15 = vld [vmem:[#allocation7 + $0x3a0] sm:$0xff]  ;;  %v1083_v18 = vld [vmem:[#allocation7 + $0x3e8] sm:$0xff]  ;;  %v1048_v20 = vld [vmem:[#allocation7 + $0x2d0] sm:$0xff] }
  0xac   : > { %422 = vmatprep.mubr.f32.mxu0 %v3186_v0  ;;  %2590 = vmatpush1.bf16.msra.mxu0 %v2589_v45  ;;  %v1028_v45 = vld [vmem:[#allocation7 + $0x230] sm:$0xff]  ;;  %v1057_v23 = vld [vmem:[#allocation7 + $0x318] sm:$0xff]  ;;  %v2623_v26 = vpack.c.bf16 %v1083_v18, %v1079_v17  ;;  %v1078_v28 = vld [vmem:[#allocation7 + $0x3c0] sm:$0xff] }
  0xad   : > { %2592 = vmatprep.subr.bf16.mxu0 %v2591_v47  ;;  %674 = vmatmul.mubr.f32.gmra.mrb[12].mxu1 %v3425_v40  ;;  %v1024_v40 = vld [vmem:[#allocation7 + $0x210] sm:$0xff]  ;;  %v2609_v47 = vpack.c.bf16 %v1050_v39, %v1046_v37  ;;  %v1061_v25 = vld [vmem:[#allocation7 + $0x338] sm:$0xff]  ;;  %v1082_v29 = vld [vmem:[#allocation7 + $0x3e0] sm:$0xff] }
  0xae   : > { %679 = vmatprep.mubr.f32.mxu1 %v3186_v0  ;;  %2718 = vmatpush1.bf16.msra.mxu1 %v2717_v30  ;;  %v2725_v56 = vpack.c.bf16 %v1028_v45, %v1024_v40  ;;  %v235_v30 = vld [vmem:[%s3378_s30 + $0x78] sm:$0xff]  ;;  %v2739_v27 = vpack.c.bf16 %v1061_v25, %v1057_v23  ;;  %v1056_v32 = vld [vmem:[#allocation7 + $0x310] sm:$0xff]  ;;  %v1091_v61 = vld [vmem:[#allocation7 + $0x428] sm:$0xff] }
  0xaf   : > { %423 = vmatmul.mubr.f32.gmra.mrb[14].mxu0 %v3432_v53  ;;  %2720 = vmatprep.subr.bf16.mxu1 %v2719_v31  ;;  %v1060_v33 = vld [vmem:[#allocation7 + $0x330] sm:$0xff]  ;;  %v1069_v35 = vld [vmem:[#allocation7 + $0x378] sm:$0xff]  ;;  %v1095_v18 = vld [vmem:[#allocation7 + $0x448] sm:$0xff] }
  0xb0   : > { %428 = vmatprep.mubr.f32.mxu0 %v3186_v0  ;;  %2594 = vmatpush1.bf16.msra.mxu0 %v2593_v58  ;;  %v1036_v58 = vld [vmem:[#allocation7 + $0x270] sm:$0xff]  ;;  %v2741_v37 = vpack.c.bf16 %v1060_v33, %v1056_v32  ;;  %v1081_v48 = vld [vmem:[#allocation7 + $0x3d8] sm:$0xff]  ;;  %v1103_v32 = vld [vmem:[#allocation7 + $0x488] sm:$0xff] }
  0xb1   : > { %2596 = vmatprep.subr.bf16.mxu0 %v2595_v60  ;;  %680 = vmatmul.mubr.f32.gmra.mrb[14].mxu1 %v3432_v53  ;;  %v1032_v53 = vld [vmem:[#allocation7 + $0x250] sm:$0xff]  ;;  %v2613_v60 = vpack.c.bf16 %v1058_v52, %v1054_v50  ;;  %v1093_v4 = vld [vmem:[#allocation7 + $0x438] sm:$0xff] }
  0xb2   : > { %685 = vmatprep.mubr.f32.mxu1 %v3186_v0  ;;  %2722 = vmatpush1.bf16.msra.mxu1 %v2721_v43  ;;  %v2729_v6 = vpack.c.bf16 %v1036_v58, %v1032_v53  ;;  %v1064_v41 = vld [vmem:[#allocation7 + $0x350] sm:$0xff]  ;;  %v1077_v43 = vld [vmem:[#allocation7 + $0x3b8] sm:$0xff]  ;;  %v240_v53 = vld [vmem:[%s3378_s30 + $0xa0] sm:$0xff] }
  0xb3   : > { %429 = vmatmul.mubr.f32.gmra.mrb[16].mxu0 %v3439_v3  ;;  %2724 = vmatprep.subr.bf16.mxu1 %v2723_v44  ;;  %v1068_v42 = vld [vmem:[#allocation7 + $0x370] sm:$0xff]  ;;  %v237_v44 = vld [vmem:[%s3378_s30 + $0x88] sm:$0xff] }
  0xb4   : > { %434 = vmatprep.mubr.f32.mxu0 %v3186_v0  ;;  %2598 = vmatpush1.bf16.msra.mxu0 %v2597_v8  ;;  %v1044_v8 = vld [vmem:[#allocation7 + $0x2b0] sm:$0xff]  ;;  %v2745_v40 = vpack.c.bf16 %v1068_v42, %v1064_v41  ;;  %v241_v58 = vld [vmem:[%s3378_s30 + $0xa8] sm:$0xff]  ;;  %v1102_v42 = vld [vmem:[#allocation7 + $0x480] sm:$0xff] }
  0xb5   : > { %2600 = vmatprep.subr.bf16.mxu0 %v2599_v10  ;;  %686 = vmatmul.mubr.f32.gmra.mrb[16].mxu1 %v3439_v3  ;;  %v1040_v3 = vld [vmem:[#allocation7 + $0x290] sm:$0xff]  ;;  %v2617_v10 = vpack.c.bf16 %v1066_v2, %v1062_v63  ;;  %v243_v63 = vld [vmem:[%s3378_s30 + $0xb8] sm:$0xff] }
  0xb6   : > { %691 = vmatprep.mubr.f32.mxu1 %v3186_v0  ;;  %2726 = vmatpush1.bf16.msra.mxu1 %v2725_v56  ;;  %v2733_v19 = vpack.c.bf16 %v1044_v8, %v1040_v3  ;;  %v1072_v46 = vld [vmem:[#allocation7 + $0x390] sm:$0xff]  ;;  %v239_v56 = vld [vmem:[%s3378_s30 + $0x98] sm:$0xff]  ;;  %v248_v8 = vld [vmem:[%s3378_s30 + $0xe0] sm:$0xff] }
  0xb7   : > { %435 = vmatmul.mubr.f32.gmra.mrb[18].mxu0 %v3446_v16  ;;  %2728 = vmatprep.subr.bf16.mxu1 %v2727_v57  ;;  %v238_v50 = vld [vmem:[%s3378_s30 + $0x90] sm:$0xff]  ;;  %v247_v3 = vld [vmem:[%s3378_s30 + $0xd8] sm:$0xff] }
  0xb8   : > { %440 = vmatprep.mubr.f32.mxu0 %v3186_v0  ;;  %2602 = vmatpush1.bf16.msra.mxu0 %v2601_v21  ;;  %v1052_v21 = vld [vmem:[#allocation7 + $0x2f0] sm:$0xff] }
  0xb9   : > { %2604 = vmatprep.subr.bf16.mxu0 %v2603_v24  ;;  %692 = vmatmul.mubr.f32.gmra.mrb[18].mxu1 %v3446_v16  ;;  %v2735_v16 = vpack.c.bf16 %v1053_v11, %v1049_v9  ;;  %v2621_v24 = vpack.c.bf16 %v1074_v15, %v1070_v13  ;;  %v2737_v31 = vpack.c.bf16 %v1052_v21, %v1048_v20  ;;  %v1080_v55 = vld [vmem:[#allocation7 + $0x3d0] sm:$0xff]  ;;  %v249_v9 = vld [vmem:[%s3378_s30 + $0xe8] sm:$0xff]  ;;  %v251_v11 = vld [vmem:[%s3378_s30 + $0xf8] sm:$0xff] }
  0xba   : > { %697 = vmatprep.mubr.f32.mxu1 %v3186_v0  ;;  %2730 = vmatpush1.bf16.msra.mxu1 %v2729_v6  ;;  %v242_v59 = vld [vmem:[%s3378_s30 + $0xb0] sm:$0xff]  ;;  %v245_v6 = vld [vmem:[%s3378_s30 + $0xc8] sm:$0xff]  ;;  %v1090_v13 = vld [vmem:[#allocation7 + $0x420] sm:$0xff] }
  0xbb   : > { %441 = vmatmul.mubr.f32.gmra.mrb[20].mxu0 %v3453_v22  ;;  %2732 = vmatprep.subr.bf16.mxu1 %v2731_v7  ;;  %v246_v7 = vld [vmem:[%s3378_s30 + $0xd0] sm:$0xff]  ;;  %v1101_v20 = vld [vmem:[#allocation7 + $0x478] sm:$0xff] }
  0xbc   : > { %446 = vmatprep.mubr.f32.mxu0 %v3186_v0  ;;  %2606 = vmatpush1.bf16.msra.mxu0 %v2605_v34  ;;  %v1065_v34 = vld [vmem:[#allocation7 + $0x358] sm:$0xff]  ;;  %v1088_v15 = vld [vmem:[#allocation7 + $0x410] sm:$0xff] }
  0xbd   : > { %2608 = vmatprep.subr.bf16.mxu0 %v2607_v36  ;;  %698 = vmatmul.mubr.f32.gmra.mrb[20].mxu1 %v3453_v22  ;;  %v2625_v22 = vpack.c.bf16 %v1082_v29, %v1078_v28  ;;  %v236_v36 = vld [vmem:[%s3378_s30 + $0x80] sm:$0xff]  ;;  %v2743_v39 = vpack.c.bf16 %v1069_v35, %v1065_v34  ;;  %v1092_v17 = vld [vmem:[#allocation7 + $0x430] sm:$0xff]  ;;  %v1105_v34 = vld [vmem:[#allocation7 + $0x498] sm:$0xff] }
  0xbe   : > { %703 = vmatprep.mubr.f32.mxu1 %v3186_v0  ;;  %2734 = vmatpush1.bf16.msra.mxu1 %v2733_v19  ;;  %v1099_v19 = vld [vmem:[#allocation7 + $0x468] sm:$0xff]  ;;  %v2757_v25 = vpack.c.bf16 %v1092_v17, %v1088_v15  ;;  %v1098_v28 = vld [vmem:[#allocation7 + $0x460] sm:$0xff]  ;;  %v1109_v35 = vld [vmem:[#allocation7 + $0x4b8] sm:$0xff] }
  0xbf   : > { %447 = vmatmul.mubr.f32.gmra.mrb[22].mxu0 %v3460_v38  ;;  %2736 = vmatprep.subr.bf16.mxu1 %v2735_v16  ;;  %v1097_v16 = vld [vmem:[#allocation7 + $0x458] sm:$0xff]  ;;  %v1120_v15 = vld [vmem:[#allocation7 + $0x510] sm:$0xff] }
  0xc0   : > { %452 = vmatprep.mubr.f32.mxu0 %v3186_v0  ;;  %2610 = vmatpush1.bf16.msra.mxu0 %v2609_v47  ;;  %v1076_v47 = vld [vmem:[#allocation7 + $0x3b0] sm:$0xff] }
  0xc1   : > { %2612 = vmatprep.subr.bf16.mxu0 %v2611_v49  ;;  %704 = vmatmul.mubr.f32.gmra.mrb[22].mxu1 %v3460_v38  ;;  %v1073_v38 = vld [vmem:[#allocation7 + $0x398] sm:$0xff]  ;;  %v2749_v52 = vpack.c.bf16 %v1076_v47, %v1072_v46  ;;  %v1108_v46 = vld [vmem:[#allocation7 + $0x4b0] sm:$0xff]  ;;  %v1111_v47 = vld [vmem:[#allocation7 + $0x4c8] sm:$0xff] }
  0xc2   : > { %709 = vmatprep.mubr.f32.mxu1 %v3186_v0  ;;  %2738 = vmatpush1.bf16.msra.mxu1 %v2737_v31  ;;  %v2747_v45 = vpack.c.bf16 %v1077_v43, %v1073_v38  ;;  %v1085_v49 = vld [vmem:[#allocation7 + $0x3f8] sm:$0xff]  ;;  %v2759_v31 = vpack.c.bf16 %v1101_v20, %v1097_v16  ;;  %v1106_v38 = vld [vmem:[#allocation7 + $0x4a0] sm:$0xff]  ;;  %v1124_v17 = vld [vmem:[#allocation7 + $0x530] sm:$0xff] }
  0xc3   : > { %453 = vmatmul.mubr.f32.gmra.mrb[24].mxu0 %v3467_v51  ;;  %2740 = vmatprep.subr.bf16.mxu1 %v2739_v27  ;;  %v2751_v54 = vpack.c.bf16 %v1085_v49, %v1081_v48  ;;  %v1100_v27 = vld [vmem:[#allocation7 + $0x470] sm:$0xff]  ;;  %v1115_v49 = vld [vmem:[#allocation7 + $0x4e8] sm:$0xff]  ;;  %v1129_v20 = vld [vmem:[#allocation7 + $0x558] sm:$0xff] }
  0xc4   : > { %458 = vmatprep.mubr.f32.mxu0 %v3186_v0  ;;  %2614 = vmatpush1.bf16.msra.mxu0 %v2613_v60  ;;  %v1087_v60 = vld [vmem:[#allocation7 + $0x408] sm:$0xff] }
  0xc5   : > { %2616 = vmatprep.subr.bf16.mxu0 %v2615_v62  ;;  %710 = vmatmul.mubr.f32.gmra.mrb[24].mxu1 %v3467_v51  ;;  %v1084_v51 = vld [vmem:[#allocation7 + $0x3f0] sm:$0xff]  ;;  %v1089_v62 = vld [vmem:[#allocation7 + $0x418] sm:$0xff]  ;;  %v2627_v2 = vpack.c.bf16 %v1091_v61, %v1087_v60  ;;  %v1131_v16 = vld [vmem:[#allocation7 + $0x568] sm:$0xff] }
  0xc6   : > { %715 = vmatprep.mubr.f32.mxu1 %v3186_v0  ;;  %2742 = vmatpush1.bf16.msra.mxu1 %v2741_v37  ;;  %v2753_v57 = vpack.c.bf16 %v1084_v51, %v1080_v55  ;;  %v2755_v5 = vpack.c.bf16 %v1093_v4, %v1089_v62  ;;  %v2637_v51 = vpack.c.bf16 %v1106_v38, %v1102_v42  ;;  %v1112_v61 = vld [vmem:[#allocation7 + $0x4d0] sm:$0xff]  ;;  %v1123_v4 = vld [vmem:[#allocation7 + $0x528] sm:$0xff] }
  0xc7   : > { %459 = vmatmul.mubr.f32.gmra.mrb[26].mxu0 %v3474_v1  ;;  %2744 = vmatprep.subr.bf16.mxu1 %v2743_v39  ;;  %v1116_v62 = vld [vmem:[#allocation7 + $0x4f0] sm:$0xff] }
  0xc8   : > { %464 = vmatprep.mubr.f32.mxu0 %v3186_v0  ;;  %2618 = vmatpush1.bf16.msra.mxu0 %v2617_v10  ;;  %v250_v10 = vld [vmem:[%s3378_s30 + $0xf0] sm:$0xff] }
  0xc9   : > { %2620 = vmatprep.subr.bf16.mxu0 %v2619_v12  ;;  %716 = vmatmul.mubr.f32.gmra.mrb[26].mxu1 %v3474_v1  ;;  %v244_v1 = vld [vmem:[%s3378_s30 + $0xc0] sm:$0xff] }
  0xca   : > { %721 = vmatprep.mubr.f32.mxu1 %v3186_v0  ;;  %2746 = vmatpush1.bf16.msra.mxu1 %v2745_v40  ;;  %v1086_v12 = vld [vmem:[#allocation7 + $0x400] sm:$0xff]  ;;  %v2763_v40 = vpack.c.bf16 %v1109_v35, %v1105_v34 }
  0xcb   : > { %465 = vmatmul.mubr.f32.gmra.mrb[28].mxu0 %v3481_v14  ;;  %2748 = vmatprep.subr.bf16.mxu1 %v2747_v45  ;;  %v1104_v45 = vld [vmem:[#allocation7 + $0x490] sm:$0xff] }
  0xcc   : > { %470 = vmatprep.mubr.f32.mxu0 %v3186_v0  ;;  %2622 = vmatpush1.bf16.msra.mxu0 %v2621_v24  ;;  %v2629_v24 = vpack.c.bf16 %v1090_v13, %v1086_v12 }
  0xcd   : > { %2624 = vmatprep.subr.bf16.mxu0 %v2623_v26  ;;  %722 = vmatmul.mubr.f32.gmra.mrb[28].mxu1 %v3481_v14  ;;  %v1094_v26 = vld [vmem:[#allocation7 + $0x440] sm:$0xff] }
  0xce   : > { %727 = vmatprep.mubr.f32.mxu1 %v3186_v0  ;;  %2750 = vmatpush1.bf16.msra.mxu1 %v2749_v52  ;;  %v2633_v39 = vpack.c.bf16 %v1098_v28, %v1094_v26  ;;  %v1117_v52 = vld [vmem:[#allocation7 + $0x4f8] sm:$0xff]  ;;  %v2773_v28 = vpack.c.bf16 %v1124_v17, %v1120_v15 }
  0xcf   : > { %471 = vmatmul.mubr.f32.gmra.mrb[30].mxu0 %v235_v30  ;;  %2752 = vmatprep.subr.bf16.mxu1 %v2751_v54 }
  0xd0   : > { %476 = vmatprep.mubr.f32.mxu0 %v3186_v0  ;;  %2626 = vmatpush1.bf16.msra.mxu0 %v2625_v22  ;;  %v1107_v22 = vld [vmem:[#allocation7 + $0x4a8] sm:$0xff] }
  0xd1   : > { %728 = vmatmul.mubr.f32.gmra.mrb[30].mxu1 %v235_v30  ;;  %2628 = vmatprep.subr.bf16.mxu0 %v2627_v2  ;;  %v2631_v30 = vpack.c.bf16 %v1099_v19, %v1095_v18  ;;  %v1127_v18 = vld [vmem:[#allocation7 + $0x548] sm:$0xff] }
  0xd2   : > { %733 = vmatprep.mubr.f32.mxu1 %v3186_v0  ;;  %2754 = vmatpush1.bf16.msra.mxu1 %v2753_v57  ;;  %v1110_v57 = vld [vmem:[#allocation7 + $0x4c0] sm:$0xff] }
  0xd3   : > { %477 = vmatmul.mubr.f32.gmra.mrb[32].mxu0 %v236_v36  ;;  %2756 = vmatprep.subr.bf16.mxu1 %v2755_v5  ;;  %v1121_v5 = vld [vmem:[#allocation7 + $0x518] sm:$0xff] }
  0xd4   : > { %482 = vmatprep.mubr.f32.mxu0 %v3186_v0 }
  0xd5   : > { %734 = vmatmul.mubr.f32.gmra.mrb[32].mxu1 %v236_v36 }
  0xd6   : > { %739 = vmatprep.mubr.f32.mxu1 %v3186_v0 }
  0xd7   : > { %483 = vmatmul.mubr.f32.gmra.mrb[34].mxu0 %v237_v44 }
  0xd8   : > { %488 = vmatprep.mubr.f32.mxu0 %v3186_v0 }
  0xd9   : > { %740 = vmatmul.mubr.f32.gmra.mrb[34].mxu1 %v237_v44  ;;  %v2635_v44 = vpack.c.bf16 %v1107_v22, %v1103_v32  ;;  %v1128_v32 = vld [vmem:[#allocation7 + $0x550] sm:$0xff]  ;;  %v1135_v22 = vld [vmem:[#allocation7 + $0x588] sm:$0xff] }
  0xda   : > { %745 = vmatprep.mubr.f32.mxu1 %v3186_v0 }
  0xdb   : > { %489 = vmatmul.mubr.f32.gmra.mrb[36].mxu0 %v238_v50 }
  0xdc   : > { %494 = vmatprep.mubr.f32.mxu0 %v3186_v0 }
  0xdd   : > { %746 = vmatmul.mubr.f32.gmra.mrb[36].mxu1 %v238_v50  ;;  %v1113_v50 = vld [vmem:[#allocation7 + $0x4d8] sm:$0xff] }
  0xde   : > { %751 = vmatprep.mubr.f32.mxu1 %v3186_v0  ;;  %v2767_v60 = vpack.c.bf16 %v1117_v52, %v1113_v50  ;;  %v1140_v50 = vld [vmem:[#allocation7 + $0x5b0] sm:$0xff]  ;;  %v1143_v52 = vld [vmem:[#allocation7 + $0x5c8] sm:$0xff] }
  0xdf   : > { %495 = vmatmul.mubr.f32.gmra.mrb[38].mxu0 %v239_v56 }
  0xe0   : > { %500 = vmatprep.mubr.f32.mxu0 %v3186_v0 }
  0xe1   : > { %752 = vmatmul.mubr.f32.gmra.mrb[38].mxu1 %v239_v56  ;;  %v2765_v56 = vpack.c.bf16 %v1108_v46, %v1104_v45  ;;  %v1138_v45 = vld [vmem:[#allocation7 + $0x5a0] sm:$0xff] }
  0xe2   : > { %757 = vmatprep.mubr.f32.mxu1 %v3186_v0 }
  0xe3   : > { %501 = vmatmul.mubr.f32.gmra.mrb[40].mxu0 %v240_v53 }
  0xe4   : > { %506 = vmatprep.mubr.f32.mxu0 %v3186_v0 }
  0xe5   : > { %758 = vmatmul.mubr.f32.gmra.mrb[40].mxu1 %v240_v53  ;;  %v1114_v53 = vld [vmem:[#allocation7 + $0x4e0] sm:$0xff] }
  0xe6   : > { %763 = vmatprep.mubr.f32.mxu1 %v3186_v0 }
  0xe7   : > { %507 = vmatmul.mubr.f32.gmra.mrb[42].mxu0 %v241_v58 }
  0xe8   : > { %512 = vmatprep.mubr.f32.mxu0 %v3186_v0 }
  0xe9   : > { %764 = vmatmul.mubr.f32.gmra.mrb[42].mxu1 %v241_v58 }
  0xea   : > { %769 = vmatprep.mubr.f32.mxu1 %v3186_v0 }
  0xeb   : > { %513 = vmatmul.mubr.f32.gmra.mrb[44].mxu0 %v242_v59 }
  0xec   : > { %518 = vmatprep.mubr.f32.mxu0 %v3186_v0 }
  0xed   : > { %770 = vmatmul.mubr.f32.gmra.mrb[44].mxu1 %v242_v59  ;;  %v2639_v59 = vpack.c.bf16 %v1115_v49, %v1111_v47  ;;  %v1136_v49 = vld [vmem:[#allocation7 + $0x590] sm:$0xff] }
  0xee   : > { %775 = vmatprep.mubr.f32.mxu1 %v3186_v0 }
  0xef   : > { %519 = vmatmul.mubr.f32.gmra.mrb[46].mxu0 %v243_v63 }
  0xf0   : > { %524 = vmatprep.mubr.f32.mxu0 %v3186_v0 }
  0xf1   : > { %776 = vmatmul.mubr.f32.gmra.mrb[46].mxu1 %v243_v63  ;;  %v1119_v63 = vld [vmem:[#allocation7 + $0x508] sm:$0xff] }
  0xf2   : > { %781 = vmatprep.mubr.f32.mxu1 %v3186_v0  ;;  %v2643_v12 = vpack.c.bf16 %v1123_v4, %v1119_v63  ;;  %v1146_v63 = vld [vmem:[#allocation7 + $0x5e0] sm:$0xff] }
  0xf3   : > { %525 = vmatmul.mubr.f32.gmra.mrb[48].mxu0 %v244_v1 }
  0xf4   : > { %530 = vmatprep.mubr.f32.mxu0 %v3186_v0 }
  0xf5   : > { %782 = vmatmul.mubr.f32.gmra.mrb[48].mxu1 %v244_v1  ;;  %v1125_v1 = vld [vmem:[#allocation7 + $0x538] sm:$0xff] }
  0xf6   : > { %787 = vmatprep.mubr.f32.mxu1 %v3186_v0  ;;  %v2771_v13 = vpack.c.bf16 %v1125_v1, %v1121_v5  ;;  %v1144_v1 = vld [vmem:[#allocation7 + $0x5d0] sm:$0xff] }
  0xf7   : > { %531 = vmatmul.mubr.f32.gmra.mrb[50].mxu0 %v245_v6 }
  0xf8   : > { %536 = vmatprep.mubr.f32.mxu0 %v3186_v0 }
  0xf9   : > { %788 = vmatmul.mubr.f32.gmra.mrb[50].mxu1 %v245_v6 }
  0xfa   : > { %793 = vmatprep.mubr.f32.mxu1 %v3186_v0 }
  0xfb   : > { %537 = vmatmul.mubr.f32.gmra.mrb[52].mxu0 %v246_v7 }
  0xfc   : > { %542 = vmatprep.mubr.f32.mxu0 %v3186_v0 }
  0xfd   : > { %794 = vmatmul.mubr.f32.gmra.mrb[52].mxu1 %v246_v7 }
  0xfe   : > { %799 = vmatprep.mubr.f32.mxu1 %v3186_v0 }
  0xff   : > { %543 = vmatmul.mubr.f32.gmra.mrb[54].mxu0 %v247_v3 }
 0x100   : > { %548 = vmatprep.mubr.f32.mxu0 %v3186_v0 }
 0x101   : > { %800 = vmatmul.mubr.f32.gmra.mrb[54].mxu1 %v247_v3  ;;  %v2641_v3 = vpack.c.bf16 %v1114_v53, %v1110_v57  ;;  %v1149_v57 = vld [vmem:[#allocation7 + $0x5f8] sm:$0xff] }
 0x102   : > { %805 = vmatprep.mubr.f32.mxu1 %v3186_v0 }
 0x103   : > { %549 = vmatmul.mubr.f32.gmra.mrb[56].mxu0 %v248_v8 }
 0x104   : > { %554 = vmatprep.mubr.f32.mxu0 %v3186_v0 }
 0x105   : > { %806 = vmatmul.mubr.f32.gmra.mrb[56].mxu1 %v248_v8  ;;  %v2769_v8 = vpack.c.bf16 %v1116_v62, %v1112_v61  ;;  %v2781_v61 = vpack.c.bf16 %v1140_v50, %v1136_v49  ;;  %v1142_v62 = vld [vmem:[#allocation7 + $0x5c0] sm:$0xff]  ;;  %v1169_v49 = vld [vmem:[#allocation7 + $0x698] sm:$0xff] }
 0x106   : > { %811 = vmatprep.mubr.f32.mxu1 %v3186_v0  ;;  %v2657_v17 = vpack.c.bf16 %v1146_v63, %v1142_v62  ;;  %v1173_v50 = vld [vmem:[#allocation7 + $0x6b8] sm:$0xff]  ;;  %v1168_v63 = vld [vmem:[#allocation7 + $0x690] sm:$0xff] }
 0x107   : > { %555 = vmatmul.mubr.f32.gmra.mrb[58].mxu0 %v249_v9  ;;  %v2795_v62 = vpack.c.bf16 %v1173_v50, %v1169_v49  ;;  %v1195_v49 = vld [vmem:[#allocation7 + $0x768] sm:$0xff]  ;;  %v1193_v50 = vld [vmem:[#allocation7 + $0x758] sm:$0xff] }
 0x108   : > { %560 = vmatprep.mubr.f32.mxu0 %v3186_v0 }
 0x109   : > { %812 = vmatmul.mubr.f32.gmra.mrb[58].mxu1 %v249_v9  ;;  %v1118_v9 = vld [vmem:[#allocation7 + $0x500] sm:$0xff] }
 0x10a   : > { %817 = vmatprep.mubr.f32.mxu1 %v3186_v0 }
 0x10b   : > { %561 = vmatmul.mubr.f32.gmra.mrb[60].mxu0 %v250_v10 }
 0x10c   : > { %566 = vmatprep.mubr.f32.mxu0 %v3186_v0 }
 0x10d   : > { %818 = vmatmul.mubr.f32.gmra.mrb[60].mxu1 %v250_v10  ;;  %v1122_v10 = vld [vmem:[#allocation7 + $0x520] sm:$0xff] }
 0x10e   : > { %823 = vmatprep.mubr.f32.mxu1 %v3186_v0  ;;  %v1096_v0 = vld [vmem:[#allocation7 + $0x450] sm:$0xff]  ;;  %v2645_v26 = vpack.c.bf16 %v1122_v10, %v1118_v9  ;;  %v1155_v9 = vld [vmem:[#allocation7 + $0x628] sm:$0xff]  ;;  %v1153_v10 = vld [vmem:[#allocation7 + $0x618] sm:$0xff] }
 0x10f   : > { %567 = vmatmul.mubr.f32.gmra.mrb[62].mxu0 %v251_v11  ;;  %v2761_v41 = vpack.c.bf16 %v1100_v27, %v1096_v0  ;;  %v2647_v0 = vpack.c.bf16 %v1131_v16, %v1127_v18  ;;  %v1154_v16 = vld [vmem:[#allocation7 + $0x620] sm:$0xff] }
 0x111   : > { %824 = vmatmul.mubr.f32.gmra.mrb[62].mxu1 %v251_v11 }
 0x166   : > { %v382_v14 = vpop.f32.mrb[0].mxu0 }
 0x167   : > { %v384_v21 = vpop.f32.mrb[1].mxu0  ;;  %v830_v29 = vmax.f32 %v382_v14, 0.0 }
 0x168   : > { %v831_v23 = vmax.f32 %v384_v21, 0.0  ;;  %v3544_v14 = vpop.f32.mrb[0].mxu1  ;;  %v1133_v21 = vld [vmem:[#allocation7 + $0x578] sm:$0xff] }
 0x169   : > { %v2775_v27 = vpack.c.bf16 %v1133_v21, %v1129_v20 }
 0x16a   : > { %v388_v33 = vpop.f32.mrb[2].mxu0  ;;  %1278 = vmatprep.mubr.f32.mxu0 %v831_v23  ;;  %1792 = vmatprep.mubr.f32.mxu1 %v831_v23  ;;  %v3546_v23 = vpop.f32.mrb[1].mxu1 }
 0x16b   : > { %v390_v36 = vpop.f32.mrb[3].mxu0  ;;  %1279 = vmatmul.mubr.f32.vlgmr.msra.gmra.mrb[64].mxu0 %v830_v29  ;;  %1793 = vmatmul.mubr.f32.vlgmr.msra.gmra.mrb[64].mxu1 %v830_v29  ;;  %v834_v43 = vmax.f32 %v388_v33, 0.0  ;;  %v1126_v29 = vld [vmem:[#allocation7 + $0x540] sm:$0xff]  ;;  %v1132_v33 = vld [vmem:[#allocation7 + $0x570] sm:$0xff] }
 0x16c   : > { %v835_v37 = vmax.f32 %v390_v36, 0.0  ;;  %2630 = vmatpush1.bf16.msra.mxu0 %v2629_v24  ;;  %2758 = vmatpush1.bf16.msra.mxu1 %v2757_v25  ;;  %v3548_v34 = vpop.f32.mrb[2].mxu1  ;;  %v1139_v36 = vld [vmem:[#allocation7 + $0x5a8] sm:$0xff] }
 0x16d   : > { %2632 = vmatprep.subr.bf16.mxu0 %v2631_v30  ;;  %2760 = vmatprep.subr.bf16.mxu1 %v2759_v31  ;;  %v1130_v30 = vld [vmem:[#allocation7 + $0x560] sm:$0xff]  ;;  %v2651_v47 = vpack.c.bf16 %v1139_v36, %v1135_v22 }
 0x16e   : > { %v394_v48 = vpop.f32.mrb[4].mxu0  ;;  %1284 = vmatprep.mubr.f32.mxu0 %v835_v37  ;;  %1798 = vmatprep.mubr.f32.mxu1 %v835_v37  ;;  %v1137_v37 = vld [vmem:[#allocation7 + $0x598] sm:$0xff] }
 0x16f   : > { %v396_v54 = vpop.f32.mrb[5].mxu0  ;;  %1285 = vmatmul.mubr.f32.gmra.mrb[66].mxu0 %v834_v43  ;;  %1799 = vmatmul.mubr.f32.gmra.mrb[66].mxu1 %v834_v43  ;;  %v838_v58 = vmax.f32 %v394_v48, 0.0  ;;  %v2649_v43 = vpack.c.bf16 %v1130_v30, %v1126_v29 }
 0x170   : > { %v839_v55 = vmax.f32 %v396_v54, 0.0  ;;  %2634 = vmatpush1.bf16.msra.mxu0 %v2633_v39  ;;  %2762 = vmatpush1.bf16.msra.mxu1 %v2761_v41  ;;  %v1141_v39 = vld [vmem:[#allocation7 + $0x5b8] sm:$0xff]  ;;  %v3550_v41 = vpop.f32.mrb[3].mxu1 }
 0x171   : > { %2636 = vmatprep.subr.bf16.mxu0 %v2635_v44  ;;  %2764 = vmatprep.subr.bf16.mxu1 %v2763_v40  ;;  %v2777_v44 = vpack.c.bf16 %v1132_v33, %v1128_v32  ;;  %v1134_v40 = vld [vmem:[#allocation7 + $0x580] sm:$0xff]  ;;  %v2779_v48 = vpack.c.bf16 %v1141_v39, %v1137_v37  ;;  %v3552_v54 = vpop.f32.mrb[4].mxu1 }
 0x172   : > { %v400_v2 = vpop.f32.mrb[6].mxu0  ;;  %1290 = vmatprep.mubr.f32.mxu0 %v839_v55  ;;  %1804 = vmatprep.mubr.f32.mxu1 %v839_v55  ;;  %v3554_v53 = vpop.f32.mrb[5].mxu1  ;;  %v1158_v37 = vld [vmem:[#allocation7 + $0x640] sm:$0xff] }
 0x173   : > { %v402_v6 = vpop.f32.mrb[7].mxu0  ;;  %1291 = vmatmul.mubr.f32.gmra.mrb[68].mxu0 %v838_v58  ;;  %1805 = vmatmul.mubr.f32.gmra.mrb[68].mxu1 %v838_v58  ;;  %v842_v11 = vmax.f32 %v400_v2, 0.0  ;;  %v1162_v39 = vld [vmem:[#allocation7 + $0x660] sm:$0xff] }
 0x174   : > { %v843_v7 = vmax.f32 %v402_v6, 0.0  ;;  %2638 = vmatpush1.bf16.msra.mxu0 %v2637_v51  ;;  %2766 = vmatpush1.bf16.msra.mxu1 %v2765_v56  ;;  %v1147_v51 = vld [vmem:[#allocation7 + $0x5e8] sm:$0xff]  ;;  %v1145_v56 = vld [vmem:[#allocation7 + $0x5d8] sm:$0xff]  ;;  %v1148_v6 = vld [vmem:[#allocation7 + $0x5f0] sm:$0xff] }
 0x175   : > { %2640 = vmatprep.subr.bf16.mxu0 %v2639_v59  ;;  %2768 = vmatprep.subr.bf16.mxu1 %v2767_v60  ;;  %v2653_v60 = vpack.c.bf16 %v1138_v45, %v1134_v40  ;;  %v2655_v4 = vpack.c.bf16 %v1147_v51, %v1143_v52  ;;  %v2783_v5 = vpack.c.bf16 %v1149_v57, %v1145_v56  ;;  %v1164_v40 = vld [vmem:[#allocation7 + $0x670] sm:$0xff]  ;;  %v1167_v45 = vld [vmem:[#allocation7 + $0x688] sm:$0xff] }
 0x176   : > { %v406_v19 = vpop.f32.mrb[8].mxu0  ;;  %1296 = vmatprep.mubr.f32.mxu0 %v843_v7  ;;  %1810 = vmatprep.mubr.f32.mxu1 %v843_v7  ;;  %v1151_v7 = vld [vmem:[#allocation7 + $0x608] sm:$0xff]  ;;  %v2785_v18 = vpack.c.bf16 %v1148_v6, %v1144_v1  ;;  %v2665_v56 = vpack.c.bf16 %v1162_v39, %v1158_v37  ;;  %v1182_v37 = vld [vmem:[#allocation7 + $0x700] sm:$0xff] }
 0x177   : > { %v408_v24 = vpop.f32.mrb[9].mxu0  ;;  %1297 = vmatmul.mubr.f32.gmra.mrb[70].mxu0 %v842_v11  ;;  %1811 = vmatmul.mubr.f32.gmra.mrb[70].mxu1 %v842_v11  ;;  %v846_v31 = vmax.f32 %v406_v19, 0.0  ;;  %v1157_v11 = vld [vmem:[#allocation7 + $0x638] sm:$0xff]  ;;  %v1150_v19 = vld [vmem:[#allocation7 + $0x600] sm:$0xff]  ;;  %v2659_v21 = vpack.c.bf16 %v1155_v9, %v1151_v7  ;;  %v1179_v6 = vld [vmem:[#allocation7 + $0x6e8] sm:$0xff] }
 0x178   : > { %v847_v25 = vmax.f32 %v408_v24, 0.0  ;;  %2642 = vmatpush1.bf16.msra.mxu0 %v2641_v3  ;;  %2770 = vmatpush1.bf16.msra.mxu1 %v2769_v8  ;;  %v3556_v3 = vpop.f32.mrb[6].mxu1  ;;  %v2787_v24 = vpack.c.bf16 %v1157_v11, %v1153_v10  ;;  %v1177_v7 = vld [vmem:[#allocation7 + $0x6d8] sm:$0xff]  ;;  %v1186_v39 = vld [vmem:[#allocation7 + $0x720] sm:$0xff] }
 0x179   : > { %2644 = vmatprep.subr.bf16.mxu0 %v2643_v12  ;;  %2772 = vmatprep.subr.bf16.mxu1 %v2771_v13  ;;  %v3558_v12 = vpop.f32.mrb[7].mxu1 }
 0x17a   : > { %v412_v35 = vpop.f32.mrb[10].mxu0  ;;  %1302 = vmatprep.mubr.f32.mxu0 %v847_v25  ;;  %1816 = vmatprep.mubr.f32.mxu1 %v847_v25  ;;  %v1152_v25 = vld [vmem:[#allocation7 + $0x610] sm:$0xff]  ;;  %v3560_v29 = vpop.f32.mrb[8].mxu1 }
 0x17b   : > { %v414_v42 = vpop.f32.mrb[11].mxu0  ;;  %1303 = vmatmul.mubr.f32.gmra.mrb[72].mxu0 %v846_v31  ;;  %1817 = vmatmul.mubr.f32.gmra.mrb[72].mxu1 %v846_v31  ;;  %v850_v46 = vmax.f32 %v412_v35, 0.0  ;;  %v1163_v31 = vld [vmem:[#allocation7 + $0x668] sm:$0xff]  ;;  %v3562_v32 = vpop.f32.mrb[9].mxu1  ;;  %v2661_v35 = vpack.c.bf16 %v1154_v16, %v1150_v19 }
 0x17c   : > { %v851_v38 = vmax.f32 %v414_v42, 0.0  ;;  %2646 = vmatpush1.bf16.msra.mxu0 %v2645_v26  ;;  %2774 = vmatpush1.bf16.msra.mxu1 %v2773_v28  ;;  %v1156_v26 = vld [vmem:[#allocation7 + $0x630] sm:$0xff]  ;;  %v1159_v28 = vld [vmem:[#allocation7 + $0x648] sm:$0xff] }
 0x17d   : > { %2648 = vmatprep.subr.bf16.mxu0 %v2647_v0  ;;  %2776 = vmatprep.subr.bf16.mxu1 %v2775_v27  ;;  %v1161_v0 = vld [vmem:[#allocation7 + $0x658] sm:$0xff]  ;;  %v2789_v36 = vpack.c.bf16 %v1156_v26, %v1152_v25  ;;  %v1183_v25 = vld [vmem:[#allocation7 + $0x708] sm:$0xff] }
 0x17e   : > { %v418_v55 = vpop.f32.mrb[12].mxu0  ;;  %1308 = vmatprep.mubr.f32.mxu0 %v851_v38  ;;  %1822 = vmatprep.mubr.f32.mxu1 %v851_v38  ;;  %v1165_v27 = vld [vmem:[#allocation7 + $0x678] sm:$0xff]  ;;  %v2663_v38 = vpack.c.bf16 %v1163_v31, %v1159_v28 }
 0x17f   : > { %v420_v58 = vpop.f32.mrb[13].mxu0  ;;  %1309 = vmatmul.mubr.f32.gmra.mrb[74].mxu0 %v850_v46  ;;  %1823 = vmatmul.mubr.f32.gmra.mrb[74].mxu1 %v850_v46  ;;  %v854_v2 = vmax.f32 %v418_v55, 0.0  ;;  %v3564_v46 = vpop.f32.mrb[10].mxu1  ;;  %v1185_v31 = vld [vmem:[#allocation7 + $0x718] sm:$0xff] }
 0x180   : > { %v855_v59 = vmax.f32 %v420_v58, 0.0  ;;  %2650 = vmatpush1.bf16.msra.mxu0 %v2649_v43  ;;  %2778 = vmatpush1.bf16.msra.mxu1 %v2777_v44  ;;  %v2791_v43 = vpack.c.bf16 %v1165_v27, %v1161_v0  ;;  %v1160_v44 = vld [vmem:[#allocation7 + $0x650] sm:$0xff]  ;;  %v3566_v52 = vpop.f32.mrb[11].mxu1  ;;  %v1166_v58 = vld [vmem:[#allocation7 + $0x680] sm:$0xff]  ;;  %v1189_v0 = vld [vmem:[#allocation7 + $0x738] sm:$0xff] }
 0x181   : > { %2652 = vmatprep.subr.bf16.mxu0 %v2651_v47  ;;  %2780 = vmatprep.subr.bf16.mxu1 %v2779_v48  ;;  %v1171_v48 = vld [vmem:[#allocation7 + $0x6a8] sm:$0xff]  ;;  %v2793_v57 = vpack.c.bf16 %v1164_v40, %v1160_v44  ;;  %v1184_v44 = vld [vmem:[#allocation7 + $0x710] sm:$0xff] }
 0x182   : > { %v424_v8 = vpop.f32.mrb[14].mxu0  ;;  %1314 = vmatprep.mubr.f32.mxu0 %v855_v59  ;;  %1828 = vmatprep.mubr.f32.mxu1 %v855_v59  ;;  %v1170_v59 = vld [vmem:[#allocation7 + $0x6a0] sm:$0xff]  ;;  %v1188_v40 = vld [vmem:[#allocation7 + $0x730] sm:$0xff] }
 0x183   : > { %v426_v13 = vpop.f32.mrb[15].mxu0  ;;  %1315 = vmatmul.mubr.f32.gmra.mrb[76].mxu0 %v854_v2  ;;  %1829 = vmatmul.mubr.f32.gmra.mrb[76].mxu1 %v854_v2  ;;  %v858_v20 = vmax.f32 %v424_v8, 0.0  ;;  %v1172_v2 = vld [vmem:[#allocation7 + $0x6b0] sm:$0xff]  ;;  %v1181_v8 = vld [vmem:[#allocation7 + $0x6f8] sm:$0xff] }
 0x184   : > { %v859_v15 = vmax.f32 %v426_v13, 0.0  ;;  %2654 = vmatpush1.bf16.msra.mxu0 %v2653_v60  ;;  %2782 = vmatpush1.bf16.msra.mxu1 %v2781_v61  ;;  %v2667_v61 = vpack.c.bf16 %v1171_v48, %v1167_v45  ;;  %v2669_v13 = vpack.c.bf16 %v1170_v59, %v1166_v58  ;;  %v1191_v45 = vld [vmem:[#allocation7 + $0x748] sm:$0xff]  ;;  %v2677_v58 = vpack.c.bf16 %v1186_v39, %v1182_v37  ;;  %v1213_v37 = vld [vmem:[#allocation7 + $0x7f8] sm:$0xff] }
 0x185   : > { %2656 = vmatprep.subr.bf16.mxu0 %v2655_v4  ;;  %2784 = vmatprep.subr.bf16.mxu1 %v2783_v5  ;;  %v1175_v4 = vld [vmem:[#allocation7 + $0x6c8] sm:$0xff]  ;;  %v3568_v5 = vpop.f32.mrb[12].mxu1  ;;  %v2805_v59 = vpack.c.bf16 %v1188_v40, %v1184_v44  ;;  %v1206_v40 = vld [vmem:[#allocation7 + $0x7c0] sm:$0xff] }
 0x186   : > { %v430_v30 = vpop.f32.mrb[16].mxu0  ;;  %1320 = vmatprep.mubr.f32.mxu0 %v859_v15  ;;  %1834 = vmatprep.mubr.f32.mxu1 %v859_v15  ;;  %v3570_v9 = vpop.f32.mrb[13].mxu1  ;;  %v2797_v15 = vpack.c.bf16 %v1172_v2, %v1168_v63  ;;  %v2671_v16 = vpack.c.bf16 %v1179_v6, %v1175_v4  ;;  %v2679_v63 = vpack.c.bf16 %v1195_v49, %v1191_v45  ;;  %v1192_v4 = vld [vmem:[#allocation7 + $0x750] sm:$0xff]  ;;  %v1199_v6 = vld [vmem:[#allocation7 + $0x788] sm:$0xff] }
 0x187   : > { %v432_v33 = vpop.f32.mrb[17].mxu0  ;;  %1321 = vmatmul.mubr.f32.gmra.mrb[78].mxu0 %v858_v20  ;;  %1835 = vmatmul.mubr.f32.gmra.mrb[78].mxu1 %v858_v20  ;;  %v862_v42 = vmax.f32 %v430_v30, 0.0  ;;  %v2799_v20 = vpack.c.bf16 %v1181_v8, %v1177_v7  ;;  %v3572_v26 = vpop.f32.mrb[14].mxu1  ;;  %v1187_v30 = vld [vmem:[#allocation7 + $0x728] sm:$0xff] }
 0x188   : > { %v863_v22 = vmax.f32 %v432_v33, 0.0  ;;  %2658 = vmatpush1.bf16.msra.mxu0 %v2657_v17  ;;  %2786 = vmatpush1.bf16.msra.mxu1 %v2785_v18  ;;  %v1174_v17 = vld [vmem:[#allocation7 + $0x6c0] sm:$0xff]  ;;  %v3574_v27 = vpop.f32.mrb[15].mxu1 }
 0x189   : > { %2660 = vmatprep.subr.bf16.mxu0 %v2659_v21  ;;  %2788 = vmatprep.subr.bf16.mxu1 %v2787_v24  ;;  %v1178_v18 = vld [vmem:[#allocation7 + $0x6e0] sm:$0xff]  ;;  %v1176_v21 = vld [vmem:[#allocation7 + $0x6d0] sm:$0xff] }
 0x18a   : > { %v436_v47 = vpop.f32.mrb[18].mxu0  ;;  %1326 = vmatprep.mubr.f32.mxu0 %v863_v22  ;;  %1840 = vmatprep.mubr.f32.mxu1 %v863_v22  ;;  %v1180_v24 = vld [vmem:[#allocation7 + $0x6f0] sm:$0xff] }
 0x18b   : > { %v438_v55 = vpop.f32.mrb[19].mxu0  ;;  %1327 = vmatmul.mubr.f32.gmra.mrb[80].mxu0 %v862_v42  ;;  %1841 = vmatmul.mubr.f32.gmra.mrb[80].mxu1 %v862_v42  ;;  %v866_v60 = vmax.f32 %v436_v47, 0.0  ;;  %v3576_v47 = vpop.f32.mrb[16].mxu1 }
 0x18c   : > { %v867_v51 = vmax.f32 %v438_v55, 0.0  ;;  %2662 = vmatpush1.bf16.msra.mxu0 %v2661_v35  ;;  %2790 = vmatpush1.bf16.msra.mxu1 %v2789_v36  ;;  %v2673_v35 = vpack.c.bf16 %v1178_v18, %v1174_v17  ;;  %v2801_v36 = vpack.c.bf16 %v1180_v24, %v1176_v21  ;;  %v1197_v55 = vld [vmem:[#allocation7 + $0x778] sm:$0xff]  ;;  %v1202_v21 = vld [vmem:[#allocation7 + $0x7a0] sm:$0xff] }
 0x18d   : > { %2664 = vmatprep.subr.bf16.mxu0 %v2663_v38  ;;  %2792 = vmatprep.subr.bf16.mxu1 %v2791_v43  ;;  %v2675_v38 = vpack.c.bf16 %v1187_v30, %v1183_v25  ;;  %v2803_v43 = vpack.c.bf16 %v1189_v0, %v1185_v31  ;;  %v2807_v2 = vpack.c.bf16 %v1197_v55, %v1193_v50  ;;  %v1200_v30 = vld [vmem:[#allocation7 + $0x790] sm:$0xff]  ;;  %v1207_v0 = vld [vmem:[#allocation7 + $0x7c8] sm:$0xff]  ;;  %v1210_v50 = vld [vmem:[#allocation7 + $0x7e0] sm:$0xff] }
 0x18e   : > { %v442_v1 = vpop.f32.mrb[20].mxu0  ;;  %1332 = vmatprep.mubr.f32.mxu0 %v867_v51  ;;  %1846 = vmatprep.mubr.f32.mxu1 %v867_v51  ;;  %v3578_v51 = vpop.f32.mrb[17].mxu1  ;;  %v1204_v31 = vld [vmem:[#allocation7 + $0x7b0] sm:$0xff] }
 0x18f   : > { %v444_v10 = vpop.f32.mrb[21].mxu0  ;;  %1333 = vmatmul.mubr.f32.gmra.mrb[82].mxu0 %v866_v60  ;;  %1847 = vmatmul.mubr.f32.gmra.mrb[82].mxu1 %v866_v60  ;;  %v870_v19 = vmax.f32 %v442_v1, 0.0  ;;  %v1190_v60 = vld [vmem:[#allocation7 + $0x740] sm:$0xff]  ;;  %v1196_v1 = vld [vmem:[#allocation7 + $0x770] sm:$0xff]  ;;  %v3580_v7 = vpop.f32.mrb[18].mxu1  ;;  %v2813_v44 = vpack.c.bf16 %v1204_v31, %v1200_v30 }
 0x190   : > { %v871_v11 = vmax.f32 %v444_v10, 0.0  ;;  %2666 = vmatpush1.bf16.msra.mxu0 %v2665_v56  ;;  %2794 = vmatpush1.bf16.msra.mxu1 %v2793_v57  ;;  %v1203_v10 = vld [vmem:[#allocation7 + $0x7a8] sm:$0xff]  ;;  %v1208_v55 = vld [vmem:[#allocation7 + $0x7d0] sm:$0xff] }
 0x191   : > { %2668 = vmatprep.subr.bf16.mxu0 %v2667_v61  ;;  %2796 = vmatprep.subr.bf16.mxu1 %v2795_v62  ;;  %v1194_v61 = vld [vmem:[#allocation7 + $0x760] sm:$0xff]  ;;  %v2683_v25 = vpack.c.bf16 %v1203_v10, %v1199_v6 }
 0x192   : > { %v448_v28 = vpop.f32.mrb[22].mxu0  ;;  %1338 = vmatprep.mubr.f32.mxu0 %v871_v11  ;;  %1852 = vmatprep.mubr.f32.mxu1 %v871_v11  ;;  %v1201_v11 = vld [vmem:[#allocation7 + $0x798] sm:$0xff] }
 0x193   : > { %v450_v33 = vpop.f32.mrb[23].mxu0  ;;  %1339 = vmatmul.mubr.f32.gmra.mrb[84].mxu0 %v870_v19  ;;  %1853 = vmatmul.mubr.f32.gmra.mrb[84].mxu1 %v870_v19  ;;  %v874_v42 = vmax.f32 %v448_v28, 0.0  ;;  %v2681_v19 = vpack.c.bf16 %v1194_v61, %v1190_v60 }
 0x194   : > { %v875_v22 = vmax.f32 %v450_v33, 0.0  ;;  %2670 = vmatpush1.bf16.msra.mxu0 %v2669_v13  ;;  %2798 = vmatpush1.bf16.msra.mxu1 %v2797_v15  ;;  %v1205_v13 = vld [vmem:[#allocation7 + $0x7b8] sm:$0xff]  ;;  %v3582_v15 = vpop.f32.mrb[19].mxu1 }
 0x195   : > { %2672 = vmatprep.subr.bf16.mxu0 %v2671_v16  ;;  %2800 = vmatprep.subr.bf16.mxu1 %v2799_v20  ;;  %v2809_v16 = vpack.c.bf16 %v1196_v1, %v1192_v4  ;;  %v1198_v20 = vld [vmem:[#allocation7 + $0x780] sm:$0xff]  ;;  %v2811_v28 = vpack.c.bf16 %v1205_v13, %v1201_v11  ;;  %v3584_v33 = vpop.f32.mrb[20].mxu1 }
 0x196   : > { %v454_v48 = vpop.f32.mrb[24].mxu0  ;;  %1344 = vmatprep.mubr.f32.mxu0 %v875_v22  ;;  %1858 = vmatprep.mubr.f32.mxu1 %v875_v22  ;;  %v3586_v39 = vpop.f32.mrb[21].mxu1 }
 0x197   : > { %v456_v56 = vpop.f32.mrb[25].mxu0  ;;  %1345 = vmatmul.mubr.f32.gmra.mrb[86].mxu0 %v874_v42  ;;  %1859 = vmatmul.mubr.f32.gmra.mrb[86].mxu1 %v874_v42  ;;  %v878_v62 = vmax.f32 %v454_v48, 0.0 }
 0x198   : > { %v879_v57 = vmax.f32 %v456_v56, 0.0  ;;  %2674 = vmatpush1.bf16.msra.mxu0 %v2673_v35  ;;  %2802 = vmatpush1.bf16.msra.mxu1 %v2801_v36  ;;  %v1211_v35 = vld [vmem:[#allocation7 + $0x7e8] sm:$0xff]  ;;  %v1209_v36 = vld [vmem:[#allocation7 + $0x7d8] sm:$0xff]  ;;  %v1212_v56 = vld [vmem:[#allocation7 + $0x7f0] sm:$0xff] }
 0x199   : > { %2676 = vmatprep.subr.bf16.mxu0 %v2675_v38  ;;  %2804 = vmatprep.subr.bf16.mxu1 %v2803_v43  ;;  %v2685_v43 = vpack.c.bf16 %v1202_v21, %v1198_v20  ;;  %v2687_v48 = vpack.c.bf16 %v1211_v35, %v1207_v0  ;;  %v2815_v49 = vpack.c.bf16 %v1213_v37, %v1209_v36 }
 0x19a   : > { %v460_v8 = vpop.f32.mrb[26].mxu0  ;;  %1350 = vmatprep.mubr.f32.mxu0 %v879_v57  ;;  %1864 = vmatprep.mubr.f32.mxu1 %v879_v57  ;;  %v3588_v57 = vpop.f32.mrb[22].mxu1 }
 0x19b   : > { %v462_v17 = vpop.f32.mrb[27].mxu0  ;;  %1351 = vmatmul.mubr.f32.gmra.mrb[88].mxu0 %v878_v62  ;;  %1865 = vmatmul.mubr.f32.gmra.mrb[88].mxu1 %v878_v62  ;;  %v882_v24 = vmax.f32 %v460_v8, 0.0  ;;  %v2689_v62 = vpack.c.bf16 %v1210_v50, %v1206_v40 }
 0x19c   : > { %v883_v18 = vmax.f32 %v462_v17, 0.0  ;;  %2678 = vmatpush1.bf16.msra.mxu0 %v2677_v58  ;;  %2806 = vmatpush1.bf16.msra.mxu1 %v2805_v59  ;;  %v3590_v59 = vpop.f32.mrb[23].mxu1 }
 0x19d   : > { %2680 = vmatprep.subr.bf16.mxu0 %v2679_v63  ;;  %2808 = vmatprep.subr.bf16.mxu1 %v2807_v2  ;;  %v2817_v63 = vpack.c.bf16 %v1212_v56, %v1208_v55  ;;  %v3592_v4 = vpop.f32.mrb[24].mxu1 }
 0x19e   : > { %v466_v22 = vpop.f32.mrb[28].mxu0  ;;  %1356 = vmatprep.mubr.f32.mxu0 %v883_v18  ;;  %1870 = vmatprep.mubr.f32.mxu1 %v883_v18  ;;  %v3594_v6 = vpop.f32.mrb[25].mxu1 }
 0x19f   : > { %v468_v42 = vpop.f32.mrb[29].mxu0  ;;  %1357 = vmatmul.mubr.f32.gmra.mrb[90].mxu0 %v882_v24  ;;  %1871 = vmatmul.mubr.f32.gmra.mrb[90].mxu1 %v882_v24  ;;  %v886_v45 = vmax.f32 %v466_v22, 0.0  ;;  %v3596_v13 = vpop.f32.mrb[26].mxu1 }
 0x1a0   : > { %v887_v38 = vmax.f32 %v468_v42, 0.0  ;;  %2682 = vmatpush1.bf16.msra.mxu0 %v2681_v19  ;;  %2810 = vmatpush1.bf16.msra.mxu1 %v2809_v16  ;;  %v3598_v18 = vpop.f32.mrb[27].mxu1 }
 0x1a1   : > { %2684 = vmatprep.subr.bf16.mxu0 %v2683_v25  ;;  %2812 = vmatprep.subr.bf16.mxu1 %v2811_v28  ;;  %v3600_v21 = vpop.f32.mrb[28].mxu1 }
 0x1a2   : > { %v472_v58 = vpop.f32.mrb[30].mxu0  ;;  %1362 = vmatprep.mubr.f32.mxu0 %v887_v38  ;;  %1876 = vmatprep.mubr.f32.mxu1 %v887_v38  ;;  %v3602_v25 = vpop.f32.mrb[29].mxu1 }
 0x1a3   : > { %v474_v60 = vpop.f32.mrb[31].mxu0  ;;  %1363 = vmatmul.mubr.f32.gmra.mrb[92].mxu0 %v886_v45  ;;  %1877 = vmatmul.mubr.f32.gmra.mrb[92].mxu1 %v886_v45  ;;  %v890_v2 = vmax.f32 %v472_v58, 0.0 }
 0x1a4   : > { %v891_v61 = vmax.f32 %v474_v60, 0.0  ;;  %2686 = vmatpush1.bf16.msra.mxu0 %v2685_v43  ;;  %2814 = vmatpush1.bf16.msra.mxu1 %v2813_v44  ;;  %v3604_v0 = vpop.f32.mrb[30].mxu1 }
 0x1a5   : > { %2688 = vmatprep.subr.bf16.mxu0 %v2687_v48  ;;  %2816 = vmatprep.subr.bf16.mxu1 %v2815_v49  ;;  %v3606_v35 = vpop.f32.mrb[31].mxu1 }
 0x1a6   : > { %v478_v1 = vpop.f32.mrb[32].mxu0  ;;  %1368 = vmatprep.mubr.f32.mxu0 %v891_v61  ;;  %1882 = vmatprep.mubr.f32.mxu1 %v891_v61 }
 0x1a7   : > { %v480_v8 = vpop.f32.mrb[33].mxu0  ;;  %1369 = vmatmul.mubr.f32.gmra.mrb[94].mxu0 %v890_v2  ;;  %1883 = vmatmul.mubr.f32.gmra.mrb[94].mxu1 %v890_v2  ;;  %v894_v11 = vmax.f32 %v478_v1, 0.0 }
 0x1a8   : > { %v895_v10 = vmax.f32 %v480_v8, 0.0  ;;  %2690 = vmatpush1.bf16.msra.mxu0 %v2689_v62  ;;  %2818 = vmatpush1.bf16.msra.mxu1 %v2817_v63  ;;  %v3608_v38 = vpop.f32.mrb[32].mxu1 }
 0x1a9   : > { %v3610_v44 = vpop.f32.mrb[33].mxu1 }
 0x1aa   : > { %v484_v17 = vpop.f32.mrb[34].mxu0  ;;  %1374 = vmatprep.mubr.f32.mxu0 %v895_v10  ;;  %1888 = vmatprep.mubr.f32.mxu1 %v895_v10 }
 0x1ab   : > { %v486_v19 = vpop.f32.mrb[35].mxu0  ;;  %1375 = vmatmul.mubr.f32.gmra.mrb[96].mxu0 %v894_v11  ;;  %1889 = vmatmul.mubr.f32.gmra.mrb[96].mxu1 %v894_v11  ;;  %v898_v20 = vmax.f32 %v484_v17, 0.0 }
 0x1ac   : > { %v899_v16 = vmax.f32 %v486_v19, 0.0  ;;  %v3612_v49 = vpop.f32.mrb[34].mxu1 }
 0x1ad   : > { %v3614_v55 = vpop.f32.mrb[35].mxu1 }
 0x1ae   : > { %v490_v24 = vpop.f32.mrb[36].mxu0  ;;  %1380 = vmatprep.mubr.f32.mxu0 %v899_v16  ;;  %1894 = vmatprep.mubr.f32.mxu1 %v899_v16 }
 0x1af   : > { %v492_v28 = vpop.f32.mrb[37].mxu0  ;;  %1381 = vmatmul.mubr.f32.gmra.mrb[98].mxu0 %v898_v20  ;;  %1895 = vmatmul.mubr.f32.gmra.mrb[98].mxu1 %v898_v20  ;;  %v902_v31 = vmax.f32 %v490_v24, 0.0 }
 0x1b0   : > { %v903_v30 = vmax.f32 %v492_v28, 0.0  ;;  %v3616_v61 = vpop.f32.mrb[36].mxu1 }
 0x1b1   : > { %v3618_v63 = vpop.f32.mrb[37].mxu1 }
 0x1b2   : > { %v496_v22 = vpop.f32.mrb[38].mxu0  ;;  %1386 = vmatprep.mubr.f32.mxu0 %v903_v30  ;;  %1900 = vmatprep.mubr.f32.mxu1 %v903_v30 }
 0x1b3   : > { %v498_v36 = vpop.f32.mrb[39].mxu0  ;;  %1387 = vmatmul.mubr.f32.gmra.mrb[100].mxu0 %v902_v31  ;;  %1901 = vmatmul.mubr.f32.gmra.mrb[100].mxu1 %v902_v31  ;;  %v906_v42 = vmax.f32 %v496_v22, 0.0 }
 0x1b4   : > { %v907_v37 = vmax.f32 %v498_v36, 0.0  ;;  %v3620_v10 = vpop.f32.mrb[38].mxu1 }
 0x1b5   : > { %v3622_v17 = vpop.f32.mrb[39].mxu1 }
 0x1b6   : > { %v502_v43 = vpop.f32.mrb[40].mxu0  ;;  %1392 = vmatprep.mubr.f32.mxu0 %v907_v37  ;;  %1906 = vmatprep.mubr.f32.mxu1 %v907_v37 }
 0x1b7   : > { %v504_v40 = vpop.f32.mrb[41].mxu0  ;;  %1393 = vmatmul.mubr.f32.gmra.mrb[102].mxu0 %v906_v42  ;;  %1907 = vmatmul.mubr.f32.gmra.mrb[102].mxu1 %v906_v42  ;;  %v910_v48 = vmax.f32 %v502_v43, 0.0 }
 0x1b8   : > { %v911_v45 = vmax.f32 %v504_v40, 0.0  ;;  %v3624_v24 = vpop.f32.mrb[40].mxu1 }
 0x1b9   : > { %v3626_v30 = vpop.f32.mrb[41].mxu1 }
 0x1ba   : > { %v508_v50 = vpop.f32.mrb[42].mxu0  ;;  %1398 = vmatprep.mubr.f32.mxu0 %v911_v45  ;;  %1912 = vmatprep.mubr.f32.mxu1 %v911_v45 }
 0x1bb   : > { %v510_v56 = vpop.f32.mrb[43].mxu0  ;;  %1399 = vmatmul.mubr.f32.gmra.mrb[104].mxu0 %v910_v48  ;;  %1913 = vmatmul.mubr.f32.gmra.mrb[104].mxu1 %v910_v48  ;;  %v914_v60 = vmax.f32 %v508_v50, 0.0 }
 0x1bc   : > { %v915_v58 = vmax.f32 %v510_v56, 0.0  ;;  %v3628_v37 = vpop.f32.mrb[42].mxu1 }
 0x1bd   : > { %v3630_v43 = vpop.f32.mrb[43].mxu1 }
 0x1be   : > { %v514_v62 = vpop.f32.mrb[44].mxu0  ;;  %1404 = vmatprep.mubr.f32.mxu0 %v915_v58  ;;  %1918 = vmatprep.mubr.f32.mxu1 %v915_v58 }
 0x1bf   : > { %v516_v2 = vpop.f32.mrb[45].mxu0  ;;  %1405 = vmatmul.mubr.f32.gmra.mrb[106].mxu0 %v914_v60  ;;  %1919 = vmatmul.mubr.f32.gmra.mrb[106].mxu1 %v914_v60  ;;  %v918_v8 = vmax.f32 %v514_v62, 0.0 }
 0x1c0   : > { %v919_v1 = vmax.f32 %v516_v2, 0.0  ;;  %v3632_v50 = vpop.f32.mrb[44].mxu1 }
 0x1c1   : > { %v3634_v58 = vpop.f32.mrb[45].mxu1 }
 0x1c2   : > { %v520_v11 = vpop.f32.mrb[46].mxu0  ;;  %1410 = vmatprep.mubr.f32.mxu0 %v919_v1  ;;  %1924 = vmatprep.mubr.f32.mxu1 %v919_v1 }
 0x1c3   : > { %v522_v19 = vpop.f32.mrb[47].mxu0  ;;  %1411 = vmatmul.mubr.f32.gmra.mrb[108].mxu0 %v918_v8  ;;  %1925 = vmatmul.mubr.f32.gmra.mrb[108].mxu1 %v918_v8  ;;  %v922_v20 = vmax.f32 %v520_v11, 0.0 }
 0x1c4   : > { %v923_v16 = vmax.f32 %v522_v19, 0.0  ;;  %v3636_v1 = vpop.f32.mrb[46].mxu1 }
 0x1c5   : > { %v3638_v11 = vpop.f32.mrb[47].mxu1 }
 0x1c6   : > { %v526_v28 = vpop.f32.mrb[48].mxu0  ;;  %1416 = vmatprep.mubr.f32.mxu0 %v923_v16  ;;  %1930 = vmatprep.mubr.f32.mxu1 %v923_v16 }
 0x1c7   : > { %v528_v31 = vpop.f32.mrb[49].mxu0  ;;  %1417 = vmatmul.mubr.f32.gmra.mrb[110].mxu0 %v922_v20  ;;  %1931 = vmatmul.mubr.f32.gmra.mrb[110].mxu1 %v922_v20  ;;  %v926_v36 = vmax.f32 %v526_v28, 0.0 }
 0x1c8   : > { %v927_v22 = vmax.f32 %v528_v31, 0.0  ;;  %v3640_v28 = vpop.f32.mrb[48].mxu1 }
 0x1ca   : > { %v532_v42 = vpop.f32.mrb[50].mxu0  ;;  %1422 = vmatprep.mubr.f32.mxu0 %v927_v22  ;;  %1936 = vmatprep.mubr.f32.mxu1 %v927_v22  ;;  %v3642_v22 = vpop.f32.mrb[49].mxu1 }
 0x1cb   : > { %v534_v40 = vpop.f32.mrb[51].mxu0  ;;  %1423 = vmatmul.mubr.f32.gmra.mrb[112].mxu0 %v926_v36  ;;  %1937 = vmatmul.mubr.f32.gmra.mrb[112].mxu1 %v926_v36  ;;  %v930_v48 = vmax.f32 %v532_v42, 0.0 }
 0x1cc   : > { %v931_v45 = vmax.f32 %v534_v40, 0.0 }
 0x1ce   : > { %v538_v56 = vpop.f32.mrb[52].mxu0  ;;  %1428 = vmatprep.mubr.f32.mxu0 %v931_v45  ;;  %1942 = vmatprep.mubr.f32.mxu1 %v931_v45  ;;  %v3644_v45 = vpop.f32.mrb[50].mxu1 }
 0x1cf   : > { %v540_v60 = vpop.f32.mrb[53].mxu0  ;;  %1429 = vmatmul.mubr.f32.gmra.mrb[114].mxu0 %v930_v48  ;;  %1943 = vmatmul.mubr.f32.gmra.mrb[114].mxu1 %v930_v48  ;;  %v934_v2 = vmax.f32 %v538_v56, 0.0  ;;  %3935 = vst [vmem:[#allocation12_spill] sm:$0xff] %v3644_v45  ;;  %v3646_v56 = vpop.f32.mrb[51].mxu1 }
 0x1d0   : > { %v935_v62 = vmax.f32 %v540_v60, 0.0 }
 0x1d2   : > { %v544_v8 = vpop.f32.mrb[54].mxu0  ;;  %1434 = vmatprep.mubr.f32.mxu0 %v935_v62  ;;  %1948 = vmatprep.mubr.f32.mxu1 %v935_v62 }
 0x1d3   : > { %v546_v19 = vpop.f32.mrb[55].mxu0  ;;  %1435 = vmatmul.mubr.f32.gmra.mrb[116].mxu0 %v934_v2  ;;  %1949 = vmatmul.mubr.f32.gmra.mrb[116].mxu1 %v934_v2  ;;  %v938_v20 = vmax.f32 %v544_v8, 0.0  ;;  %v3648_v8 = vpop.f32.mrb[52].mxu1 }
 0x1d4   : > { %v939_v16 = vmax.f32 %v546_v19, 0.0  ;;  %3936 = vst [vmem:[#allocation13_spill] sm:$0xff] %v3648_v8 }
 0x1d6   : > { %v550_v31 = vpop.f32.mrb[56].mxu0  ;;  %1440 = vmatprep.mubr.f32.mxu0 %v939_v16  ;;  %1954 = vmatprep.mubr.f32.mxu1 %v939_v16  ;;  %v3650_v16 = vpop.f32.mrb[53].mxu1 }
 0x1d7   : > { %v552_v36 = vpop.f32.mrb[57].mxu0  ;;  %1441 = vmatmul.mubr.f32.gmra.mrb[118].mxu0 %v938_v20  ;;  %1955 = vmatmul.mubr.f32.gmra.mrb[118].mxu1 %v938_v20  ;;  %v942_v40 = vmax.f32 %v550_v31, 0.0  ;;  %3937 = vst [vmem:[#allocation14_spill] sm:$0xff] %v3650_v16  ;;  %v833_v16 = vmax.f32 %v3546_v23, 0.0  ;;  %v836_v23 = vmax.f32 %v3548_v34, 0.0  ;;  %v844_v34 = vmax.f32 %v3556_v3, 0.0 }
 0x1d8   : > { %v943_v42 = vmax.f32 %v552_v36, 0.0  ;;  %v856_v3 = vmax.f32 %v3568_v5, 0.0  ;;  %v868_v5 = vmax.f32 %v3580_v7, 0.0  ;;  %v880_v7 = vmax.f32 %v3592_v4, 0.0 }
 0x1d9   : > { %v892_v4 = vmax.f32 %v3604_v0, 0.0  ;;  %v904_v0 = vmax.f32 %v3616_v61, 0.0  ;;  %v916_v61 = vmax.f32 %v3628_v37, 0.0  ;;  %v928_v37 = vmax.f32 %v3640_v28, 0.0 }
 0x1da   : > { %v556_v48 = vpop.f32.mrb[58].mxu0  ;;  %1446 = vmatprep.mubr.f32.mxu0 %v943_v42  ;;  %1960 = vmatprep.mubr.f32.mxu1 %v943_v42  ;;  %v3652_v42 = vpop.f32.mrb[54].mxu1 }
 0x1db   : > { %v558_v60 = vpop.f32.mrb[59].mxu0  ;;  %1447 = vmatmul.mubr.f32.gmra.mrb[120].mxu0 %v942_v40  ;;  %1961 = vmatmul.mubr.f32.gmra.mrb[120].mxu1 %v942_v40  ;;  %v946_v2 = vmax.f32 %v556_v48, 0.0  ;;  %v3654_v40 = vpop.f32.mrb[55].mxu1  ;;  %v940_v28 = vmax.f32 %v3652_v42, 0.0 }
 0x1dc   : > { %v947_v62 = vmax.f32 %v558_v60, 0.0 }
 0x1de   : > { %v562_v19 = vpop.f32.mrb[60].mxu0  ;;  %1452 = vmatprep.mubr.f32.mxu0 %v947_v62  ;;  %1966 = vmatprep.mubr.f32.mxu1 %v947_v62  ;;  %v3656_v62 = vpop.f32.mrb[56].mxu1 }
 0x1df   : > { %v564_v20 = vpop.f32.mrb[61].mxu0  ;;  %1453 = vmatmul.mubr.f32.gmra.mrb[122].mxu0 %v946_v2  ;;  %1967 = vmatmul.mubr.f32.gmra.mrb[122].mxu1 %v946_v2  ;;  %v950_v36 = vmax.f32 %v562_v19, 0.0  ;;  %v3659_v2 = vpop.f32.mrb[57].mxu1  ;;  %v832_v19 = vmax.f32 %v3544_v14, 0.0  ;;  %v840_v14 = vmax.f32 %v3552_v54, 0.0  ;;  %v848_v54 = vmax.f32 %v3560_v29, 0.0 }
 0x1e0   : > { %v951_v31 = vmax.f32 %v564_v20, 0.0  ;;  %v3662_v20 = vpop.f32.mrb[58].mxu1  ;;  %v860_v29 = vmax.f32 %v3572_v26, 0.0  ;;  %v872_v26 = vmax.f32 %v3584_v33, 0.0  ;;  %v884_v33 = vmax.f32 %v3596_v13, 0.0 }
 0x1e1   : > { %v896_v13 = vmax.f32 %v3608_v38, 0.0  ;;  %v908_v38 = vmax.f32 %v3620_v10, 0.0  ;;  %v920_v10 = vmax.f32 %v3632_v50, 0.0  ;;  %v3938_v50 = vld [vmem:[#allocation12_spill] sm:$0xff] }
 0x1e2   : > { %v568_v45 = vpop.f32.mrb[62].mxu0  ;;  %1458 = vmatprep.mubr.f32.mxu0 %v951_v31  ;;  %1972 = vmatprep.mubr.f32.mxu1 %v951_v31  ;;  %v837_v31 = vmax.f32 %v3550_v41, 0.0 }
 0x1e3   : > { %v570_v48 = vpop.f32.mrb[63].mxu0  ;;  %1459 = vmatmul.mubr.f32.gmra.mrb[124].mxu0 %v950_v36  ;;  %1973 = vmatmul.mubr.f32.gmra.mrb[124].mxu1 %v950_v36  ;;  %v954_v8 = vmax.f32 %v568_v45, 0.0  ;;  %v3665_v36 = vpop.f32.mrb[59].mxu1 }
 0x1e4   : > { %v955_v60 = vmax.f32 %v570_v48, 0.0  ;;  %v3668_v45 = vpop.f32.mrb[60].mxu1 }
 0x1e5   : > { %v3671_v48 = vpop.f32.mrb[61].mxu1  ;;  %v952_v42 = vmax.f32 %v3668_v45, 0.0 }
 0x1e6   : > { %1464 = vmatprep.mubr.f32.mxu0 %v955_v60  ;;  %1978 = vmatprep.mubr.f32.mxu1 %v955_v60  ;;  %v3674_v41 = vpop.f32.mrb[62].mxu1 }
 0x1e7   : > { %1465 = vmatmul.mubr.f32.gmra.mrb[126].mxu0 %v954_v8  ;;  %1979 = vmatmul.mubr.f32.gmra.mrb[126].mxu1 %v954_v8  ;;  %v841_v8 = vmax.f32 %v3554_v53, 0.0  ;;  %v3677_v60 = vpop.f32.mrb[63].mxu1  ;;  %v849_v53 = vmax.f32 %v3562_v32, 0.0  ;;  %v861_v32 = vmax.f32 %v3574_v27, 0.0  ;;  %v873_v27 = vmax.f32 %v3586_v39, 0.0 }
 0x1e8   : > { %1535 = vmatprep.mubr.f32.mxu0 %v833_v16  ;;  %2049 = vmatprep.mubr.f32.mxu1 %v833_v16  ;;  %v845_v16 = vmax.f32 %v3558_v12, 0.0  ;;  %v852_v12 = vmax.f32 %v3564_v46, 0.0  ;;  %v864_v46 = vmax.f32 %v3576_v47, 0.0  ;;  %v876_v47 = vmax.f32 %v3588_v57, 0.0 }
 0x1e9   : > { %v885_v39 = vmax.f32 %v3598_v18, 0.0  ;;  %v888_v57 = vmax.f32 %v3600_v21, 0.0  ;;  %v897_v18 = vmax.f32 %v3610_v44, 0.0  ;;  %v900_v21 = vmax.f32 %v3612_v49, 0.0 }
 0x1ea   : > { %v909_v44 = vmax.f32 %v3622_v17, 0.0  ;;  %v912_v49 = vmax.f32 %v3624_v24, 0.0  ;;  %v921_v17 = vmax.f32 %v3634_v58, 0.0  ;;  %v924_v24 = vmax.f32 %v3636_v1, 0.0  ;;  %v3940_v1 = vld [vmem:[#allocation13_spill] sm:$0xff] }
 0x1eb   : > { %1536 = vmatmul.mubr.f32.vlgmr.msra.gmra.mrb[64].mxu0 %v832_v19  ;;  %2050 = vmatmul.mubr.f32.vlgmr.msra.gmra.mrb[64].mxu1 %v832_v19  ;;  %v853_v19 = vmax.f32 %v3566_v52, 0.0  ;;  %v865_v52 = vmax.f32 %v3578_v51, 0.0  ;;  %v877_v51 = vmax.f32 %v3590_v59, 0.0  ;;  %v889_v59 = vmax.f32 %v3602_v25, 0.0 }
 0x1ec   : > { %1541 = vmatprep.mubr.f32.mxu0 %v837_v31  ;;  %2055 = vmatprep.mubr.f32.mxu1 %v837_v31  ;;  %v857_v31 = vmax.f32 %v3570_v9, 0.0  ;;  %v869_v9 = vmax.f32 %v3582_v15, 0.0  ;;  %v881_v15 = vmax.f32 %v3594_v6, 0.0  ;;  %v893_v6 = vmax.f32 %v3606_v35, 0.0 }
 0x1ed   : > { %v901_v25 = vmax.f32 %v3614_v55, 0.0  ;;  %v905_v35 = vmax.f32 %v3618_v63, 0.0  ;;  %v913_v55 = vmax.f32 %v3626_v30, 0.0  ;;  %v917_v63 = vmax.f32 %v3630_v43, 0.0 }
 0x1ee   : > { %v925_v30 = vmax.f32 %v3638_v11, 0.0  ;;  %v929_v43 = vmax.f32 %v3642_v22, 0.0  ;;  %v933_v58 = vmax.f32 %v3646_v56, 0.0  ;;  %v932_v11 = vmax.f32 %v3938_v50, 0.0 }
 0x1ef   : > { %1542 = vmatmul.mubr.f32.gmra.mrb[66].mxu0 %v836_v23  ;;  %2056 = vmatmul.mubr.f32.gmra.mrb[66].mxu1 %v836_v23  ;;  %v3939_v23 = vld [vmem:[#allocation14_spill] sm:$0xff]  ;;  %v936_v22 = vmax.f32 %v3940_v1, 0.0  ;;  %v945_v56 = vmax.f32 %v3659_v2, 0.0  ;;  %v957_v2 = vmax.f32 %v3677_v60, 0.0 }
 0x1f0   : > { %1547 = vmatprep.mubr.f32.mxu0 %v841_v8  ;;  %2061 = vmatprep.mubr.f32.mxu1 %v841_v8  ;;  %v937_v8 = vmax.f32 %v3939_v23, 0.0 }
 0x1f3   : > { %1548 = vmatmul.mubr.f32.gmra.mrb[68].mxu0 %v840_v14  ;;  %2062 = vmatmul.mubr.f32.gmra.mrb[68].mxu1 %v840_v14  ;;  %v941_v14 = vmax.f32 %v3654_v40, 0.0  ;;  %v948_v40 = vmax.f32 %v3662_v20, 0.0 }
 0x1f4   : > { %1553 = vmatprep.mubr.f32.mxu0 %v845_v16  ;;  %2067 = vmatprep.mubr.f32.mxu1 %v845_v16  ;;  %v944_v16 = vmax.f32 %v3656_v62, 0.0  ;;  %v956_v62 = vmax.f32 %v3674_v41, 0.0 }
 0x1f7   : > { %1554 = vmatmul.mubr.f32.gmra.mrb[70].mxu0 %v844_v34  ;;  %2068 = vmatmul.mubr.f32.gmra.mrb[70].mxu1 %v844_v34  ;;  %v949_v34 = vmax.f32 %v3665_v36, 0.0 }
 0x1f8   : > { %1559 = vmatprep.mubr.f32.mxu0 %v849_v53  ;;  %2073 = vmatprep.mubr.f32.mxu1 %v849_v53  ;;  %v953_v53 = vmax.f32 %v3671_v48, 0.0 }
 0x1fb   : > { %1560 = vmatmul.mubr.f32.gmra.mrb[72].mxu0 %v848_v54  ;;  %2074 = vmatmul.mubr.f32.gmra.mrb[72].mxu1 %v848_v54 }
 0x1fc   : > { %1565 = vmatprep.mubr.f32.mxu0 %v853_v19  ;;  %2079 = vmatprep.mubr.f32.mxu1 %v853_v19 }
 0x1ff   : > { %1566 = vmatmul.mubr.f32.gmra.mrb[74].mxu0 %v852_v12  ;;  %2080 = vmatmul.mubr.f32.gmra.mrb[74].mxu1 %v852_v12 }
 0x200   : > { %1571 = vmatprep.mubr.f32.mxu0 %v857_v31  ;;  %2085 = vmatprep.mubr.f32.mxu1 %v857_v31 }
 0x203   : > { %1572 = vmatmul.mubr.f32.gmra.mrb[76].mxu0 %v856_v3  ;;  %2086 = vmatmul.mubr.f32.gmra.mrb[76].mxu1 %v856_v3 }
 0x204   : > { %1577 = vmatprep.mubr.f32.mxu0 %v861_v32  ;;  %2091 = vmatprep.mubr.f32.mxu1 %v861_v32 }
 0x207   : > { %1578 = vmatmul.mubr.f32.gmra.mrb[78].mxu0 %v860_v29  ;;  %2092 = vmatmul.mubr.f32.gmra.mrb[78].mxu1 %v860_v29 }
 0x208   : > { %1583 = vmatprep.mubr.f32.mxu0 %v865_v52  ;;  %2097 = vmatprep.mubr.f32.mxu1 %v865_v52 }
 0x20b   : > { %1584 = vmatmul.mubr.f32.gmra.mrb[80].mxu0 %v864_v46  ;;  %2098 = vmatmul.mubr.f32.gmra.mrb[80].mxu1 %v864_v46 }
 0x20c   : > { %1589 = vmatprep.mubr.f32.mxu0 %v869_v9  ;;  %2103 = vmatprep.mubr.f32.mxu1 %v869_v9 }
 0x20f   : > { %1590 = vmatmul.mubr.f32.gmra.mrb[82].mxu0 %v868_v5  ;;  %2104 = vmatmul.mubr.f32.gmra.mrb[82].mxu1 %v868_v5 }
 0x210   : > { %1595 = vmatprep.mubr.f32.mxu0 %v873_v27  ;;  %2109 = vmatprep.mubr.f32.mxu1 %v873_v27 }
 0x213   : > { %1596 = vmatmul.mubr.f32.gmra.mrb[84].mxu0 %v872_v26  ;;  %2110 = vmatmul.mubr.f32.gmra.mrb[84].mxu1 %v872_v26 }
 0x214   : > { %1601 = vmatprep.mubr.f32.mxu0 %v877_v51  ;;  %2115 = vmatprep.mubr.f32.mxu1 %v877_v51 }
 0x217   : > { %1602 = vmatmul.mubr.f32.gmra.mrb[86].mxu0 %v876_v47  ;;  %2116 = vmatmul.mubr.f32.gmra.mrb[86].mxu1 %v876_v47 }
 0x218   : > { %1607 = vmatprep.mubr.f32.mxu0 %v881_v15  ;;  %2121 = vmatprep.mubr.f32.mxu1 %v881_v15 }
 0x21b   : > { %1608 = vmatmul.mubr.f32.gmra.mrb[88].mxu0 %v880_v7  ;;  %2122 = vmatmul.mubr.f32.gmra.mrb[88].mxu1 %v880_v7 }
 0x21c   : > { %1613 = vmatprep.mubr.f32.mxu0 %v885_v39  ;;  %2127 = vmatprep.mubr.f32.mxu1 %v885_v39 }
 0x21f   : > { %1614 = vmatmul.mubr.f32.gmra.mrb[90].mxu0 %v884_v33  ;;  %2128 = vmatmul.mubr.f32.gmra.mrb[90].mxu1 %v884_v33 }
 0x220   : > { %1619 = vmatprep.mubr.f32.mxu0 %v889_v59  ;;  %2133 = vmatprep.mubr.f32.mxu1 %v889_v59 }
 0x223   : > { %1620 = vmatmul.mubr.f32.gmra.mrb[92].mxu0 %v888_v57  ;;  %2134 = vmatmul.mubr.f32.gmra.mrb[92].mxu1 %v888_v57 }
 0x224   : > { %1625 = vmatprep.mubr.f32.mxu0 %v893_v6  ;;  %2139 = vmatprep.mubr.f32.mxu1 %v893_v6 }
 0x227   : > { %1626 = vmatmul.mubr.f32.gmra.mrb[94].mxu0 %v892_v4  ;;  %2140 = vmatmul.mubr.f32.gmra.mrb[94].mxu1 %v892_v4 }
 0x228   : > { %1631 = vmatprep.mubr.f32.mxu0 %v897_v18  ;;  %2145 = vmatprep.mubr.f32.mxu1 %v897_v18 }
 0x22b   : > { %1632 = vmatmul.mubr.f32.gmra.mrb[96].mxu0 %v896_v13  ;;  %2146 = vmatmul.mubr.f32.gmra.mrb[96].mxu1 %v896_v13 }
 0x22c   : > { %1637 = vmatprep.mubr.f32.mxu0 %v901_v25  ;;  %2151 = vmatprep.mubr.f32.mxu1 %v901_v25 }
 0x22f   : > { %1638 = vmatmul.mubr.f32.gmra.mrb[98].mxu0 %v900_v21  ;;  %2152 = vmatmul.mubr.f32.gmra.mrb[98].mxu1 %v900_v21 }
 0x230   : > { %1643 = vmatprep.mubr.f32.mxu0 %v905_v35  ;;  %2157 = vmatprep.mubr.f32.mxu1 %v905_v35 }
 0x233   : > { %1644 = vmatmul.mubr.f32.gmra.mrb[100].mxu0 %v904_v0  ;;  %2158 = vmatmul.mubr.f32.gmra.mrb[100].mxu1 %v904_v0 }
 0x234   : > { %1649 = vmatprep.mubr.f32.mxu0 %v909_v44  ;;  %2163 = vmatprep.mubr.f32.mxu1 %v909_v44 }
 0x237   : > { %1650 = vmatmul.mubr.f32.gmra.mrb[102].mxu0 %v908_v38  ;;  %2164 = vmatmul.mubr.f32.gmra.mrb[102].mxu1 %v908_v38 }
 0x238   : > { %1655 = vmatprep.mubr.f32.mxu0 %v913_v55  ;;  %2169 = vmatprep.mubr.f32.mxu1 %v913_v55 }
 0x23b   : > { %1656 = vmatmul.mubr.f32.gmra.mrb[104].mxu0 %v912_v49  ;;  %2170 = vmatmul.mubr.f32.gmra.mrb[104].mxu1 %v912_v49 }
 0x23c   : > { %1661 = vmatprep.mubr.f32.mxu0 %v917_v63  ;;  %2175 = vmatprep.mubr.f32.mxu1 %v917_v63 }
 0x23f   : > { %1662 = vmatmul.mubr.f32.gmra.mrb[106].mxu0 %v916_v61  ;;  %2176 = vmatmul.mubr.f32.gmra.mrb[106].mxu1 %v916_v61 }
 0x240   : > { %1667 = vmatprep.mubr.f32.mxu0 %v921_v17  ;;  %2181 = vmatprep.mubr.f32.mxu1 %v921_v17 }
 0x243   : > { %1668 = vmatmul.mubr.f32.gmra.mrb[108].mxu0 %v920_v10  ;;  %2182 = vmatmul.mubr.f32.gmra.mrb[108].mxu1 %v920_v10 }
 0x244   : > { %1673 = vmatprep.mubr.f32.mxu0 %v925_v30  ;;  %2187 = vmatprep.mubr.f32.mxu1 %v925_v30 }
 0x247   : > { %1674 = vmatmul.mubr.f32.gmra.mrb[110].mxu0 %v924_v24  ;;  %2188 = vmatmul.mubr.f32.gmra.mrb[110].mxu1 %v924_v24 }
 0x248   : > { %1679 = vmatprep.mubr.f32.mxu0 %v929_v43  ;;  %2193 = vmatprep.mubr.f32.mxu1 %v929_v43 }
 0x24b   : > { %1680 = vmatmul.mubr.f32.gmra.mrb[112].mxu0 %v928_v37  ;;  %2194 = vmatmul.mubr.f32.gmra.mrb[112].mxu1 %v928_v37 }
 0x24c   : > { %1685 = vmatprep.mubr.f32.mxu0 %v933_v58  ;;  %2199 = vmatprep.mubr.f32.mxu1 %v933_v58 }
 0x24f   : > { %1686 = vmatmul.mubr.f32.gmra.mrb[114].mxu0 %v932_v11  ;;  %2200 = vmatmul.mubr.f32.gmra.mrb[114].mxu1 %v932_v11 }
 0x250   : > { %1691 = vmatprep.mubr.f32.mxu0 %v937_v8  ;;  %2205 = vmatprep.mubr.f32.mxu1 %v937_v8 }
 0x253   : > { %1692 = vmatmul.mubr.f32.gmra.mrb[116].mxu0 %v936_v22  ;;  %2206 = vmatmul.mubr.f32.gmra.mrb[116].mxu1 %v936_v22 }
 0x254   : > { %1697 = vmatprep.mubr.f32.mxu0 %v941_v14  ;;  %2211 = vmatprep.mubr.f32.mxu1 %v941_v14 }
 0x257   : > { %1698 = vmatmul.mubr.f32.gmra.mrb[118].mxu0 %v940_v28  ;;  %2212 = vmatmul.mubr.f32.gmra.mrb[118].mxu1 %v940_v28 }
 0x258   : > { %1703 = vmatprep.mubr.f32.mxu0 %v945_v56  ;;  %2217 = vmatprep.mubr.f32.mxu1 %v945_v56 }
 0x25b   : > { %1704 = vmatmul.mubr.f32.gmra.mrb[120].mxu0 %v944_v16  ;;  %2218 = vmatmul.mubr.f32.gmra.mrb[120].mxu1 %v944_v16 }
 0x25c   : > { %1709 = vmatprep.mubr.f32.mxu0 %v949_v34  ;;  %2223 = vmatprep.mubr.f32.mxu1 %v949_v34 }
 0x25f   : > { %1710 = vmatmul.mubr.f32.gmra.mrb[122].mxu0 %v948_v40  ;;  %2224 = vmatmul.mubr.f32.gmra.mrb[122].mxu1 %v948_v40 }
 0x260   : > { %1715 = vmatprep.mubr.f32.mxu0 %v953_v53  ;;  %2229 = vmatprep.mubr.f32.mxu1 %v953_v53 }
 0x263   : > { %1716 = vmatmul.mubr.f32.gmra.mrb[124].mxu0 %v952_v42  ;;  %2230 = vmatmul.mubr.f32.gmra.mrb[124].mxu1 %v952_v42 }
 0x264   : > { %1721 = vmatprep.mubr.f32.mxu0 %v957_v2  ;;  %2235 = vmatprep.mubr.f32.mxu1 %v957_v2 }
 0x267   : > { %1722 = vmatmul.mubr.f32.gmra.mrb[126].mxu0 %v956_v62  ;;  %2236 = vmatmul.mubr.f32.gmra.mrb[126].mxu1 %v956_v62 }
 0x2be   : > { %v1537_v20 = vpop.f32.mrb[64].mxu0  ;;  %v2051_v36 = vpop.f32.mrb[64].mxu1 }
 0x2bf   : > { %2242 = vst [vmem:[%s3737_s20] sm:$0xff] %v1537_v20  ;;  %2244 = vst [vmem:[%s3737_s20 + $0x10] sm:$0xff] %v2051_v36  ;;  %v1539_v45 = vpop.f32.mrb[65].mxu0  ;;  %v2053_v48 = vpop.f32.mrb[65].mxu1 }
 0x2c0   : > { %2243 = vst [vmem:[%s3737_s20 + $0x8] sm:$0xff] %v1539_v45  ;;  %2245 = vst [vmem:[%s3737_s20 + $0x18] sm:$0xff] %v2053_v48 }
 0x2c2   : > { %v1543_v41 = vpop.f32.mrb[66].mxu0  ;;  %v2057_v60 = vpop.f32.mrb[66].mxu1 }
 0x2c3   : > { %2246 = vst [vmem:[%s3737_s20 + $0x20] sm:$0xff] %v1543_v41  ;;  %2248 = vst [vmem:[%s3737_s20 + $0x30] sm:$0xff] %v2057_v60  ;;  %v1545_v54 = vpop.f32.mrb[67].mxu0  ;;  %v2059_v19 = vpop.f32.mrb[67].mxu1 }
 0x2c4   : > { %2247 = vst [vmem:[%s3737_s20 + $0x28] sm:$0xff] %v1545_v54  ;;  %2249 = vst [vmem:[%s3737_s20 + $0x38] sm:$0xff] %v2059_v19 }
 0x2c6   : > { %v1549_v12 = vpop.f32.mrb[68].mxu0  ;;  %v2063_v31 = vpop.f32.mrb[68].mxu1 }
 0x2c7   : > { %2250 = vst [vmem:[%s3737_s20 + $0x40] sm:$0xff] %v1549_v12  ;;  %2252 = vst [vmem:[%s3737_s20 + $0x50] sm:$0xff] %v2063_v31  ;;  %v1551_v3 = vpop.f32.mrb[69].mxu0  ;;  %v2065_v32 = vpop.f32.mrb[69].mxu1 }
 0x2c8   : > { %2251 = vst [vmem:[%s3737_s20 + $0x48] sm:$0xff] %v1551_v3  ;;  %2253 = vst [vmem:[%s3737_s20 + $0x58] sm:$0xff] %v2065_v32 }
 0x2ca   : > { %v1555_v29 = vpop.f32.mrb[70].mxu0  ;;  %v2069_v52 = vpop.f32.mrb[70].mxu1 }
 0x2cb   : > { %2254 = vst [vmem:[%s3737_s20 + $0x60] sm:$0xff] %v1555_v29  ;;  %2256 = vst [vmem:[%s3737_s20 + $0x70] sm:$0xff] %v2069_v52  ;;  %v1557_v46 = vpop.f32.mrb[71].mxu0  ;;  %v2071_v9 = vpop.f32.mrb[71].mxu1 }
 0x2cc   : > { %2255 = vst [vmem:[%s3737_s20 + $0x68] sm:$0xff] %v1557_v46  ;;  %2257 = vst [vmem:[%s3737_s20 + $0x78] sm:$0xff] %v2071_v9 }
 0x2ce   : > { %v1561_v5 = vpop.f32.mrb[72].mxu0  ;;  %v2075_v27 = vpop.f32.mrb[72].mxu1 }
 0x2cf   : > { %2258 = vst [vmem:[%s3737_s20 + $0x80] sm:$0xff] %v1561_v5  ;;  %2260 = vst [vmem:[%s3737_s20 + $0x90] sm:$0xff] %v2075_v27  ;;  %v1563_v26 = vpop.f32.mrb[73].mxu0  ;;  %v2077_v51 = vpop.f32.mrb[73].mxu1 }
 0x2d0   : > { %2259 = vst [vmem:[%s3737_s20 + $0x88] sm:$0xff] %v1563_v26  ;;  %2261 = vst [vmem:[%s3737_s20 + $0x98] sm:$0xff] %v2077_v51 }
 0x2d2   : > { %v1567_v47 = vpop.f32.mrb[74].mxu0  ;;  %v2081_v15 = vpop.f32.mrb[74].mxu1 }
 0x2d3   : > { %2262 = vst [vmem:[%s3737_s20 + $0xa0] sm:$0xff] %v1567_v47  ;;  %2264 = vst [vmem:[%s3737_s20 + $0xb0] sm:$0xff] %v2081_v15  ;;  %v1569_v7 = vpop.f32.mrb[75].mxu0  ;;  %v2083_v39 = vpop.f32.mrb[75].mxu1 }
 0x2d4   : > { %2263 = vst [vmem:[%s3737_s20 + $0xa8] sm:$0xff] %v1569_v7  ;;  %2265 = vst [vmem:[%s3737_s20 + $0xb8] sm:$0xff] %v2083_v39 }
 0x2d6   : > { %v1573_v33 = vpop.f32.mrb[76].mxu0  ;;  %v2087_v59 = vpop.f32.mrb[76].mxu1 }
 0x2d7   : > { %2266 = vst [vmem:[%s3737_s20 + $0xc0] sm:$0xff] %v1573_v33  ;;  %2268 = vst [vmem:[%s3737_s20 + $0xd0] sm:$0xff] %v2087_v59  ;;  %v1575_v57 = vpop.f32.mrb[77].mxu0  ;;  %v2089_v6 = vpop.f32.mrb[77].mxu1 }
 0x2d8   : > { %2267 = vst [vmem:[%s3737_s20 + $0xc8] sm:$0xff] %v1575_v57  ;;  %2269 = vst [vmem:[%s3737_s20 + $0xd8] sm:$0xff] %v2089_v6 }
 0x2da   : > { %v1579_v4 = vpop.f32.mrb[78].mxu0  ;;  %v2093_v18 = vpop.f32.mrb[78].mxu1 }
 0x2db   : > { %2270 = vst [vmem:[%s3737_s20 + $0xe0] sm:$0xff] %v1579_v4  ;;  %2272 = vst [vmem:[%s3737_s20 + $0xf0] sm:$0xff] %v2093_v18  ;;  %v1581_v13 = vpop.f32.mrb[79].mxu0  ;;  %v2095_v25 = vpop.f32.mrb[79].mxu1 }
 0x2dc   : > { %2271 = vst [vmem:[%s3737_s20 + $0xe8] sm:$0xff] %v1581_v13  ;;  %2273 = vst [vmem:[%s3737_s20 + $0xf8] sm:$0xff] %v2095_v25 }
 0x2de   : > { %v1585_v21 = vpop.f32.mrb[80].mxu0  ;;  %v2099_v35 = vpop.f32.mrb[80].mxu1 }
 0x2df   : > { %2274 = vst [vmem:[%s3737_s20 + $0x100] sm:$0xff] %v1585_v21  ;;  %2276 = vst [vmem:[%s3737_s20 + $0x110] sm:$0xff] %v2099_v35  ;;  %v1587_v0 = vpop.f32.mrb[81].mxu0  ;;  %v2101_v44 = vpop.f32.mrb[81].mxu1 }
 0x2e0   : > { %2275 = vst [vmem:[%s3737_s20 + $0x108] sm:$0xff] %v1587_v0  ;;  %2277 = vst [vmem:[%s3737_s20 + $0x118] sm:$0xff] %v2101_v44 }
 0x2e2   : > { %v1591_v38 = vpop.f32.mrb[82].mxu0  ;;  %v2105_v55 = vpop.f32.mrb[82].mxu1 }
 0x2e3   : > { %2278 = vst [vmem:[%s3737_s20 + $0x120] sm:$0xff] %v1591_v38  ;;  %2280 = vst [vmem:[%s3737_s20 + $0x130] sm:$0xff] %v2105_v55  ;;  %v1593_v49 = vpop.f32.mrb[83].mxu0  ;;  %v2107_v63 = vpop.f32.mrb[83].mxu1 }
 0x2e4   : > { %2279 = vst [vmem:[%s3737_s20 + $0x128] sm:$0xff] %v1593_v49  ;;  %2281 = vst [vmem:[%s3737_s20 + $0x138] sm:$0xff] %v2107_v63 }
 0x2e6   : > { %v1597_v61 = vpop.f32.mrb[84].mxu0  ;;  %v2111_v17 = vpop.f32.mrb[84].mxu1 }
 0x2e7   : > { %2282 = vst [vmem:[%s3737_s20 + $0x140] sm:$0xff] %v1597_v61  ;;  %2284 = vst [vmem:[%s3737_s20 + $0x150] sm:$0xff] %v2111_v17  ;;  %v1599_v10 = vpop.f32.mrb[85].mxu0  ;;  %v2113_v30 = vpop.f32.mrb[85].mxu1 }
 0x2e8   : > { %2283 = vst [vmem:[%s3737_s20 + $0x148] sm:$0xff] %v1599_v10  ;;  %2285 = vst [vmem:[%s3737_s20 + $0x158] sm:$0xff] %v2113_v30 }
 0x2ea   : > { %v1603_v24 = vpop.f32.mrb[86].mxu0  ;;  %v2117_v43 = vpop.f32.mrb[86].mxu1 }
 0x2eb   : > { %2286 = vst [vmem:[%s3737_s20 + $0x160] sm:$0xff] %v1603_v24  ;;  %2288 = vst [vmem:[%s3737_s20 + $0x170] sm:$0xff] %v2117_v43  ;;  %v1605_v37 = vpop.f32.mrb[87].mxu0  ;;  %v2119_v58 = vpop.f32.mrb[87].mxu1 }
 0x2ec   : > { %2287 = vst [vmem:[%s3737_s20 + $0x168] sm:$0xff] %v1605_v37  ;;  %2289 = vst [vmem:[%s3737_s20 + $0x178] sm:$0xff] %v2119_v58 }
 0x2ee   : > { %v1609_v50 = vpop.f32.mrb[88].mxu0  ;;  %v2123_v11 = vpop.f32.mrb[88].mxu1 }
 0x2ef   : > { %2290 = vst [vmem:[%s3737_s20 + $0x180] sm:$0xff] %v1609_v50  ;;  %2292 = vst [vmem:[%s3737_s20 + $0x190] sm:$0xff] %v2123_v11  ;;  %v1611_v23 = vpop.f32.mrb[89].mxu0  ;;  %v2125_v8 = vpop.f32.mrb[89].mxu1 }
 0x2f0   : > { %2291 = vst [vmem:[%s3737_s20 + $0x188] sm:$0xff] %v1611_v23  ;;  %2293 = vst [vmem:[%s3737_s20 + $0x198] sm:$0xff] %v2125_v8 }
 0x2f2   : > { %v1615_v1 = vpop.f32.mrb[90].mxu0  ;;  %v2129_v22 = vpop.f32.mrb[90].mxu1 }
 0x2f3   : > { %2294 = vst [vmem:[%s3737_s20 + $0x1a0] sm:$0xff] %v1615_v1  ;;  %2296 = vst [vmem:[%s3737_s20 + $0x1b0] sm:$0xff] %v2129_v22  ;;  %v1617_v14 = vpop.f32.mrb[91].mxu0  ;;  %v2131_v28 = vpop.f32.mrb[91].mxu1 }
 0x2f4   : > { %2295 = vst [vmem:[%s3737_s20 + $0x1a8] sm:$0xff] %v1617_v14  ;;  %2297 = vst [vmem:[%s3737_s20 + $0x1b8] sm:$0xff] %v2131_v28 }
 0x2f6   : > { %v1621_v56 = vpop.f32.mrb[92].mxu0  ;;  %v2135_v16 = vpop.f32.mrb[92].mxu1 }
 0x2f7   : > { %2298 = vst [vmem:[%s3737_s20 + $0x1c0] sm:$0xff] %v1621_v56  ;;  %2300 = vst [vmem:[%s3737_s20 + $0x1d0] sm:$0xff] %v2135_v16  ;;  %v1623_v34 = vpop.f32.mrb[93].mxu0  ;;  %v2137_v40 = vpop.f32.mrb[93].mxu1 }
 0x2f8   : > { %2299 = vst [vmem:[%s3737_s20 + $0x1c8] sm:$0xff] %v1623_v34  ;;  %2301 = vst [vmem:[%s3737_s20 + $0x1d8] sm:$0xff] %v2137_v40 }
 0x2fa   : > { %v1627_v53 = vpop.f32.mrb[94].mxu0  ;;  %v2141_v42 = vpop.f32.mrb[94].mxu1 }
 0x2fb   : > { %2302 = vst [vmem:[%s3737_s20 + $0x1e0] sm:$0xff] %v1627_v53  ;;  %2304 = vst [vmem:[%s3737_s20 + $0x1f0] sm:$0xff] %v2141_v42  ;;  %v1629_v2 = vpop.f32.mrb[95].mxu0  ;;  %v2143_v62 = vpop.f32.mrb[95].mxu1 }
 0x2fc   : > { %2303 = vst [vmem:[%s3737_s20 + $0x1e8] sm:$0xff] %v1629_v2  ;;  %2305 = vst [vmem:[%s3737_s20 + $0x1f8] sm:$0xff] %v2143_v62 }
 0x2fe   : > { %v1633_v20 = vpop.f32.mrb[96].mxu0  ;;  %v2147_v36 = vpop.f32.mrb[96].mxu1 }
 0x2ff   : > { %2306 = vst [vmem:[%s3737_s20 + $0x200] sm:$0xff] %v1633_v20  ;;  %2308 = vst [vmem:[%s3737_s20 + $0x210] sm:$0xff] %v2147_v36  ;;  %v1635_v45 = vpop.f32.mrb[97].mxu0  ;;  %v2149_v48 = vpop.f32.mrb[97].mxu1 }
 0x300   : > { %2307 = vst [vmem:[%s3737_s20 + $0x208] sm:$0xff] %v1635_v45  ;;  %2309 = vst [vmem:[%s3737_s20 + $0x218] sm:$0xff] %v2149_v48 }
 0x302   : > { %v1639_v41 = vpop.f32.mrb[98].mxu0  ;;  %v2153_v60 = vpop.f32.mrb[98].mxu1 }
 0x303   : > { %2310 = vst [vmem:[%s3737_s20 + $0x220] sm:$0xff] %v1639_v41  ;;  %2312 = vst [vmem:[%s3737_s20 + $0x230] sm:$0xff] %v2153_v60  ;;  %v1641_v54 = vpop.f32.mrb[99].mxu0  ;;  %v2155_v19 = vpop.f32.mrb[99].mxu1 }
 0x304   : > { %2311 = vst [vmem:[%s3737_s20 + $0x228] sm:$0xff] %v1641_v54  ;;  %2313 = vst [vmem:[%s3737_s20 + $0x238] sm:$0xff] %v2155_v19 }
 0x306   : > { %v1645_v12 = vpop.f32.mrb[100].mxu0  ;;  %v2159_v31 = vpop.f32.mrb[100].mxu1 }
 0x307   : > { %2314 = vst [vmem:[%s3737_s20 + $0x240] sm:$0xff] %v1645_v12  ;;  %2316 = vst [vmem:[%s3737_s20 + $0x250] sm:$0xff] %v2159_v31  ;;  %v1647_v3 = vpop.f32.mrb[101].mxu0  ;;  %v2161_v32 = vpop.f32.mrb[101].mxu1 }
 0x308   : > { %2315 = vst [vmem:[%s3737_s20 + $0x248] sm:$0xff] %v1647_v3  ;;  %2317 = vst [vmem:[%s3737_s20 + $0x258] sm:$0xff] %v2161_v32 }
 0x30a   : > { %v1651_v29 = vpop.f32.mrb[102].mxu0  ;;  %v2165_v52 = vpop.f32.mrb[102].mxu1 }
 0x30b   : > { %2318 = vst [vmem:[%s3737_s20 + $0x260] sm:$0xff] %v1651_v29  ;;  %2320 = vst [vmem:[%s3737_s20 + $0x270] sm:$0xff] %v2165_v52  ;;  %v1653_v46 = vpop.f32.mrb[103].mxu0  ;;  %v2167_v9 = vpop.f32.mrb[103].mxu1 }
 0x30c   : > { %2319 = vst [vmem:[%s3737_s20 + $0x268] sm:$0xff] %v1653_v46  ;;  %2321 = vst [vmem:[%s3737_s20 + $0x278] sm:$0xff] %v2167_v9 }
 0x30e   : > { %v1657_v5 = vpop.f32.mrb[104].mxu0  ;;  %v2171_v27 = vpop.f32.mrb[104].mxu1 }
 0x30f   : > { %2322 = vst [vmem:[%s3737_s20 + $0x280] sm:$0xff] %v1657_v5  ;;  %2324 = vst [vmem:[%s3737_s20 + $0x290] sm:$0xff] %v2171_v27  ;;  %v1659_v26 = vpop.f32.mrb[105].mxu0  ;;  %v2173_v51 = vpop.f32.mrb[105].mxu1 }
 0x310   : > { %2323 = vst [vmem:[%s3737_s20 + $0x288] sm:$0xff] %v1659_v26  ;;  %2325 = vst [vmem:[%s3737_s20 + $0x298] sm:$0xff] %v2173_v51 }
 0x312   : > { %v1663_v47 = vpop.f32.mrb[106].mxu0  ;;  %v2177_v15 = vpop.f32.mrb[106].mxu1 }
 0x313   : > { %2326 = vst [vmem:[%s3737_s20 + $0x2a0] sm:$0xff] %v1663_v47  ;;  %2328 = vst [vmem:[%s3737_s20 + $0x2b0] sm:$0xff] %v2177_v15  ;;  %v1665_v7 = vpop.f32.mrb[107].mxu0  ;;  %v2179_v39 = vpop.f32.mrb[107].mxu1 }
 0x314   : > { %2327 = vst [vmem:[%s3737_s20 + $0x2a8] sm:$0xff] %v1665_v7  ;;  %2329 = vst [vmem:[%s3737_s20 + $0x2b8] sm:$0xff] %v2179_v39 }
 0x316   : > { %v1669_v33 = vpop.f32.mrb[108].mxu0  ;;  %v2183_v59 = vpop.f32.mrb[108].mxu1 }
 0x317   : > { %2330 = vst [vmem:[%s3737_s20 + $0x2c0] sm:$0xff] %v1669_v33  ;;  %2332 = vst [vmem:[%s3737_s20 + $0x2d0] sm:$0xff] %v2183_v59  ;;  %v1671_v57 = vpop.f32.mrb[109].mxu0  ;;  %v2185_v6 = vpop.f32.mrb[109].mxu1 }
 0x318   : > { %2331 = vst [vmem:[%s3737_s20 + $0x2c8] sm:$0xff] %v1671_v57  ;;  %2333 = vst [vmem:[%s3737_s20 + $0x2d8] sm:$0xff] %v2185_v6 }
 0x31a   : > { %v1675_v4 = vpop.f32.mrb[110].mxu0  ;;  %v2189_v18 = vpop.f32.mrb[110].mxu1 }
 0x31b   : > { %2334 = vst [vmem:[%s3737_s20 + $0x2e0] sm:$0xff] %v1675_v4  ;;  %2336 = vst [vmem:[%s3737_s20 + $0x2f0] sm:$0xff] %v2189_v18  ;;  %v1677_v13 = vpop.f32.mrb[111].mxu0  ;;  %v2191_v25 = vpop.f32.mrb[111].mxu1 }
 0x31c   : > { %2335 = vst [vmem:[%s3737_s20 + $0x2e8] sm:$0xff] %v1677_v13  ;;  %2337 = vst [vmem:[%s3737_s20 + $0x2f8] sm:$0xff] %v2191_v25 }
 0x31e   : > { %v1681_v21 = vpop.f32.mrb[112].mxu0  ;;  %v2195_v35 = vpop.f32.mrb[112].mxu1 }
 0x31f   : > { %2338 = vst [vmem:[%s3737_s20 + $0x300] sm:$0xff] %v1681_v21  ;;  %2340 = vst [vmem:[%s3737_s20 + $0x310] sm:$0xff] %v2195_v35  ;;  %v1683_v0 = vpop.f32.mrb[113].mxu0  ;;  %v2197_v44 = vpop.f32.mrb[113].mxu1 }
 0x320   : > { %2339 = vst [vmem:[%s3737_s20 + $0x308] sm:$0xff] %v1683_v0  ;;  %2341 = vst [vmem:[%s3737_s20 + $0x318] sm:$0xff] %v2197_v44 }
 0x322   : > { %v1687_v38 = vpop.f32.mrb[114].mxu0  ;;  %v2201_v55 = vpop.f32.mrb[114].mxu1 }
 0x323   : > { %2342 = vst [vmem:[%s3737_s20 + $0x320] sm:$0xff] %v1687_v38  ;;  %2344 = vst [vmem:[%s3737_s20 + $0x330] sm:$0xff] %v2201_v55  ;;  %v1689_v49 = vpop.f32.mrb[115].mxu0  ;;  %v2203_v63 = vpop.f32.mrb[115].mxu1 }
 0x324   : > { %2343 = vst [vmem:[%s3737_s20 + $0x328] sm:$0xff] %v1689_v49  ;;  %2345 = vst [vmem:[%s3737_s20 + $0x338] sm:$0xff] %v2203_v63 }
 0x326   : > { %v1693_v61 = vpop.f32.mrb[116].mxu0  ;;  %v2207_v17 = vpop.f32.mrb[116].mxu1 }
 0x327   : > { %2346 = vst [vmem:[%s3737_s20 + $0x340] sm:$0xff] %v1693_v61  ;;  %2348 = vst [vmem:[%s3737_s20 + $0x350] sm:$0xff] %v2207_v17  ;;  %v1695_v10 = vpop.f32.mrb[117].mxu0  ;;  %v2209_v30 = vpop.f32.mrb[117].mxu1 }
 0x328   : > { %2347 = vst [vmem:[%s3737_s20 + $0x348] sm:$0xff] %v1695_v10  ;;  %2349 = vst [vmem:[%s3737_s20 + $0x358] sm:$0xff] %v2209_v30 }
 0x32a   : > { %v1699_v24 = vpop.f32.mrb[118].mxu0  ;;  %v2213_v43 = vpop.f32.mrb[118].mxu1 }
 0x32b   : > { %2350 = vst [vmem:[%s3737_s20 + $0x360] sm:$0xff] %v1699_v24  ;;  %2352 = vst [vmem:[%s3737_s20 + $0x370] sm:$0xff] %v2213_v43  ;;  %v1701_v37 = vpop.f32.mrb[119].mxu0  ;;  %v2215_v58 = vpop.f32.mrb[119].mxu1 }
 0x32c   : > { %2351 = vst [vmem:[%s3737_s20 + $0x368] sm:$0xff] %v1701_v37  ;;  %2353 = vst [vmem:[%s3737_s20 + $0x378] sm:$0xff] %v2215_v58 }
 0x32e   : > { %v1705_v50 = vpop.f32.mrb[120].mxu0  ;;  %v2219_v11 = vpop.f32.mrb[120].mxu1 }
 0x32f   : > { %2354 = vst [vmem:[%s3737_s20 + $0x380] sm:$0xff] %v1705_v50  ;;  %2356 = vst [vmem:[%s3737_s20 + $0x390] sm:$0xff] %v2219_v11  ;;  %v1707_v23 = vpop.f32.mrb[121].mxu0  ;;  %v2221_v8 = vpop.f32.mrb[121].mxu1 }
 0x330   : > { %2355 = vst [vmem:[%s3737_s20 + $0x388] sm:$0xff] %v1707_v23  ;;  %2357 = vst [vmem:[%s3737_s20 + $0x398] sm:$0xff] %v2221_v8 }
 0x332   : > { %v1711_v1 = vpop.f32.mrb[122].mxu0  ;;  %v2225_v22 = vpop.f32.mrb[122].mxu1 }
 0x333   : > { %2358 = vst [vmem:[%s3737_s20 + $0x3a0] sm:$0xff] %v1711_v1  ;;  %2360 = vst [vmem:[%s3737_s20 + $0x3b0] sm:$0xff] %v2225_v22  ;;  %v1713_v14 = vpop.f32.mrb[123].mxu0  ;;  %v2227_v28 = vpop.f32.mrb[123].mxu1 }
 0x334   : > { %2359 = vst [vmem:[%s3737_s20 + $0x3a8] sm:$0xff] %v1713_v14  ;;  %2361 = vst [vmem:[%s3737_s20 + $0x3b8] sm:$0xff] %v2227_v28 }
 0x336   : > { %v1717_v56 = vpop.f32.mrb[124].mxu0  ;;  %v2231_v16 = vpop.f32.mrb[124].mxu1 }
 0x337   : > { %2362 = vst [vmem:[%s3737_s20 + $0x3c0] sm:$0xff] %v1717_v56  ;;  %2364 = vst [vmem:[%s3737_s20 + $0x3d0] sm:$0xff] %v2231_v16  ;;  %v1719_v34 = vpop.f32.mrb[125].mxu0  ;;  %v2233_v40 = vpop.f32.mrb[125].mxu1 }
 0x338   : > { %2363 = vst [vmem:[%s3737_s20 + $0x3c8] sm:$0xff] %v1719_v34  ;;  %2365 = vst [vmem:[%s3737_s20 + $0x3d8] sm:$0xff] %v2233_v40 }
 0x33a   : > { %v1723_v53 = vpop.f32.mrb[126].mxu0  ;;  %v2237_v42 = vpop.f32.mrb[126].mxu1 }
 0x33b   : > { %2366 = vst [vmem:[%s3737_s20 + $0x3e0] sm:$0xff] %v1723_v53  ;;  %2368 = vst [vmem:[%s3737_s20 + $0x3f0] sm:$0xff] %v2237_v42  ;;  %v1725_v2 = vpop.f32.mrb[127].mxu0  ;;  %v2239_v62 = vpop.f32.mrb[127].mxu1 }
 0x33c   : > { %2367 = vst [vmem:[%s3737_s20 + $0x3e8] sm:$0xff] %v1725_v2  ;;  %2369 = vst [vmem:[%s3737_s20 + $0x3f8] sm:$0xff] %v2239_v62 }
 0x33d   : > { %3120 = shalt.err (!%p3117_p7)
}
 0x33e   : > { %s3121_s7 = scalar_lea.hbm %s3868_s23, 16384  ;;  %s3125_s22 = scalar_lea.hbm %s3920_s3, 65536 }
 0x33f   : > { %p3122_p9 = scmp.ne.s32.totalorder %s3868_s23, %s3121_s7  ;;  %p3126_p5 = scmp.lt.u32.totalorder %s3868_s23, %s3920_s3 }
 0x340   : > { %p3127_p10 = scmp.lt.u32.totalorder %s3125_s22, %s3121_s7  ;;  %p3129_p1 = scmp.lt.u32.totalorder %s3121_s7, %s3868_s23 }
 0x341   : > { %p3123_p12 = pnand %p3122_p9, %p3322_p4 }
 0x342   : > { %p3128_p11 = por %p3127_p10, %p3126_p5 }
 0x343   : > { %p3124_p0 = pneg %p3123_p12 }
 0x344   : > { %p3130_p2 = por %p3129_p1, %p3128_p11 }
 0x346   : > { %p3131_p6 = pnand %p3130_p2, %p3124_p0 }
 0x348   : > { %3134 = shalt.err (!%p3131_p6)
}
 0x349   : > { %s3188_s18 = smov 512   ;;  %s3189_s20 = smov 32  }
 0x34a   : > { %2957 = dma.vmem_to_hbm [thread:$0]  (%p3322_p4), %s3870_s24, 16384, %s3868_s23, %s2371_s16, %s3188_s18, %s3188_s18, %s3189_s20  }
 0x34b PF: > { %p2979_p8 = scmp.ge.s32.totalorder %s3177_s15, 2  ;;  %s2400_s17 = sand.u32 1, %s3165_s12  }
 0x34c   : > { %p3941_p13 = scmp.ne.s32.totalorder %s3925_s19, 0  ;;  %s2401_s26 = scalar_lea.sflag [#allocation4], %s2400_s17 }
 0x34e   : > { %p2971_p3 = pnand %p2979_p8, %p3941_p13 }
 0x350   : > { %3160 = dma.done.wait (!%p2971_p3), %s2401_s26, 16384  }
 0x351   : > { %3162 = vsyncadd (!%p2971_p3), %s2401_s26, 4294950912  ;;  %p17_p7 = scmp.ge.s32.totalorder %s3312_s4, 6   ;;  %s3942_s12 = smov %s3169_s13 }
 0x352   : > { %s3943_s13 = smov %s3173_s14  ;;  %s3944_s14 = smov %s3328_s9 }
 0x353   : > { %s3945_s15 = smov %s3312_s4  ;;  %19 = sbr.rel (!%p17_p7) target bundleno = 6 (0x6), region = 85 }
 0x35a   :  { %2406 = vsyncpa [#allocation3], 1 }
 0x35b   :  { %2408 = vsyncpa [#allocation3 + $0x1], 1 }
 0x35c   :  { %2409 = vsyncpa [#allocation6], 1 }
 0x35d   :  { %2410 = vsyncpa [#allocation4], 1 }
 0x35e   :  { %2412 = vsyncpa [#allocation4 + $0x1], 1 }

</bundles_post_ra>
